<compile_context>
chip_gen: v7x
topology: tpu7x:2x2x1
jax: 0.10.0
libtpu: 0.0.40
codegen_flags: <defaults>
</compile_context>

<pallas_src>
import functools

import jax
import jax.numpy as jnp
from jax.experimental import pallas as pl
from jax.experimental.pallas import tpu as pltpu

HIDDEN = 100   # LSTM hidden size (reference)
EMB = 50       # word-embedding / hidden_2_embedding size (reference)
FEAT = 2048    # ResNet-50 feature size

H_P = 128      # padded hidden (lane-aligned gate slices)
EMB_P = 128    # padded embedding dim for the e_all intermediate

USE_BF16_MATMUL = True           # bf16 operands / f32 accumulation on the big,
                                 # non-recurrent matmuls (precision note: tiny
                                 # deviation vs. the f32 PyTorch reference)
VMEM_LIMIT = 32 * 1024 * 1024    # scoped VMEM (raises v5e's 16 MiB default)


def _round_up(x, m):
    return (x + m - 1) // m * m


# --------------------------------------------------------------------------
# Kernel 1: visual embedder + LSTMCell recurrence + hidden_2_embedding
# --------------------------------------------------------------------------
def _recurrence_kernel(
    vis_ref,      # (Bp, 2048) f32  pooled ResNet features
    emb_ref,      # (T, Bp, 50) f32 embedded padded captions (time-major)
    w_vis_ref,    # (2048, 128) f32
    b_vis_ref,    # (1, 128)    f32
    w_ih_ref,     # (50, 512)   LSTMCell weight_ih^T, gate order i,f,g,o (bf16/f32)
    w_hh_ref,     # (128, 512)  LSTMCell weight_hh^T, gate-padded (f32)
    b_gates_ref,  # (1, 512)    b_ih + b_hh, gate-padded (f32)
    w_h2e_ref,    # (128, 128)  hidden_2_embedding (bf16/f32)
    b_h2e_ref,    # (1, 128)    f32
    e_all_ref,    # (Bp, T_P, 128) f32  output: embedded hidden states, BATCH-MAJOR
    xp_ref,       # (T, Bp, 512) f32  VMEM scratch: hoisted input projection
    h_all_ref,    # (T, Bp, 128) f32  VMEM scratch: hidden states (time-major)
):
    f32 = jnp.float32
    T, Bp, E = emb_ref.shape
    Hp = w_hh_ref.shape[0]
    Tp = e_all_ref.shape[1]
    Ep = e_all_ref.shape[2]

    # visual_feature_embedder: Linear(2048, 100); c0 = embedded visual features
    c0 = jnp.dot(vis_ref[...], w_vis_ref[...], preferred_element_type=f32) + b_vis_ref[...]

    # Hoisted input projection: one big (T*Bp, 50) @ (50, 512) matmul, off the
    # serial critical path, written to a VMEM scratch for leading-axis loads.
    emb2 = emb_ref[...].reshape(T * Bp, E)                       # layout-free (Bp % 8 == 0)
    xp = (jnp.dot(emb2.astype(w_ih_ref.dtype), w_ih_ref[...],
                  preferred_element_type=f32)
          + b_gates_ref[...])                                    # (T*Bp, 512) f32
    xp_ref[...] = xp.reshape(T, Bp, 4 * Hp)

    w_hh = w_hh_ref[...]

    # LSTMCell recurrence (PyTorch gate order i, f, g, o) via fori_loop so gate
    # live ranges are bounded per iteration (no vreg spills at larger batch).
    def step(t, carry):
        h, c = carry
        gates = xp_ref[t] + jnp.dot(h, w_hh, preferred_element_type=f32)
        i_g = jax.nn.sigmoid(gates[:, 0 * Hp:1 * Hp])
        f_g = jax.nn.sigmoid(gates[:, 1 * Hp:2 * Hp])
        g_g = jnp.tanh(gates[:, 2 * Hp:3 * Hp])
        o_g = jax.nn.sigmoid(gates[:, 3 * Hp:4 * Hp])
        c_new = f_g * c + i_g * g_g
        h_new = o_g * jnp.tanh(c_new)
        h_all_ref[t] = h_new
        return (h_new, c_new)

    h0 = jnp.zeros((Bp, Hp), dtype=f32)
    jax.lax.fori_loop(0, T, step, (h0, c0))

    # hidden_2_embedding: Linear(100, 50), applied to all timesteps at once.
    h_flat = h_all_ref[...].reshape(T * Bp, Hp)
    e_flat = (jnp.dot(h_flat.astype(w_h2e_ref.dtype), w_h2e_ref[...],
                      preferred_element_type=f32)
              + b_h2e_ref[...])                                  # (T*Bp, 128)
    e3 = e_flat.reshape(T, Bp, Ep)

    # Batch-major handoff (tiny tensor): (T, Bp, 128) -> (Bp, T_P, 128).
    for t in range(T):
        e_all_ref[:, t, :] = e3[t]
    if Tp > T:  # deterministic values in the padded time rows
        e_all_ref[:, pl.ds(T, Tp - T), :] = jnp.zeros((Bp, Tp - T, Ep), f32)


# --------------------------------------------------------------------------
# Kernel 2: output projection + time-axis LogSoftmax, tiled over (batch, vocab)
# --------------------------------------------------------------------------
def _output_kernel(e_ref, w_out_ref, b_out_ref, out_ref, *, t_valid):
    f32 = jnp.float32
    BT, Tp, Ep = e_ref.shape
    TV = w_out_ref.shape[1]

    e2 = e_ref[...].reshape(BT * Tp, Ep)                         # layout-free (Tp % 8 == 0)
    logits = (jnp.dot(e2.astype(w_out_ref.dtype), w_out_ref[...],
                      preferred_element_type=f32)
              + b_out_ref[...]).reshape(BT, Tp, TV)

    # nn.LogSoftmax() with implicit dim: legacy rule picks dim=0 for 3-D input
    # (T, B, V), i.e. the softmax runs over the TIME axis.  Here the block is
    # batch-major (BT, Tp, TV), so the reduction is over axis=1 (sublane/XLU).
    # TODO(synk): this normalizes over timesteps (matches the reference model,
    # which is likely a bug in the original PyTorch code).
    if t_valid == Tp:
        masked = logits
    else:
        t_idx = jax.lax.broadcasted_iota(jnp.int32, (1, Tp, TV), 1)
        masked = jnp.where(t_idx < t_valid, logits, -jnp.inf)
    m = jnp.max(masked, axis=1, keepdims=True)
    lse = jnp.log(jnp.sum(jnp.exp(masked - m), axis=1, keepdims=True)) + m
    out_ref[...] = logits - lse


# --------------------------------------------------------------------------
# Parameter packing: zero-pad to lane/sublane-aligned shapes
# --------------------------------------------------------------------------
def _pack_params(params, v_pad, mm_dtype):
    def pad_to(x, shape):
        return jnp.pad(x, [(0, s - d) for d, s in zip(x.shape, shape)])

    def pad_gates_last(w):
        # (..., 4*HIDDEN) gate-packed (i,f,g,o) -> pad each gate block to H_P.
        parts = [w[..., k * HIDDEN:(k + 1) * HIDDEN] for k in range(4)]
        parts = [pad_to(p, p.shape[:-1] + (H_P,)) for p in parts]
        return jnp.concatenate(parts, axis=-1)

    return dict(
        w_vis=pad_to(params["w_vis"], (FEAT, H_P)),
        b_vis=pad_to(params["b_vis"], (H_P,))[None, :],
        w_ih=pad_gates_last(params["w_ih"]).astype(mm_dtype),                    # (50, 512)
        w_hh=pad_gates_last(pad_to(params["w_hh"], (H_P, 4 * HIDDEN))),          # (128, 512)
        b_gates=pad_gates_last(params["b_ih"] + params["b_hh"])[None, :],        # (1, 512)
        w_h2e=pad_to(params["w_h2e"], (H_P, EMB_P)).astype(mm_dtype),
        b_h2e=pad_to(params["b_h2e"], (EMB_P,))[None, :],
        w_out=pad_to(params["w_out"], (EMB_P, v_pad)).astype(mm_dtype),
        b_out=pad_to(params["b_out"], (v_pad,))[None, :],
    )


# --------------------------------------------------------------------------
# Wrapper
# --------------------------------------------------------------------------
def baseline_forward(cnn_trunk_nchw, padded_captions, params):
    """cnn_trunk_nchw: (B, 2048, H, W) f32 ResNet-50 trunk features (NCHW).
       padded_captions: (B, T) int32 token ids.
       Returns log-probs of shape (B, T, V) (matches .permute(1, 0, 2))."""
    B = cnn_trunk_nchw.shape[0]
    T = padded_captions.shape[1]
    V = params["w_out"].shape[1]

    # Batch padding / batch tile (Kernel 2 tiles batch so output blocks stay
    # small for the v7x 32 MiB scoped-VMEM budget and both grid axes shard).
    B_P = _round_up(max(B, 8), 8)
    BT = B_P if B_P < 32 else 32
    B_P = _round_up(B_P, BT)
    NB = B_P // BT

    # Time padded to a multiple of 8 so in-kernel reshapes stay layout-free.
    T_P = _round_up(T, 8)

    # Vocab tile: V_P aligned to 128, TV the largest divisor of V_P in
    # {512, 256, 128} -> zero extra padding beyond lane alignment.
    V_P = _round_up(V, 128)
    TV = 128
    for cand in (512, 256):
        if V_P % cand == 0:
            TV = cand
            break
    NV = V_P // TV

    mm_dtype = jnp.bfloat16 if USE_BF16_MATMUL else jnp.float32

    # self.cnn tail: AdaptiveAvgPool2d((1,1)) + Flatten, done in the wrapper so
    # the kernel never DMAs the raw (B, 2048, H, W) feature map.
    vis = jnp.mean(cnn_trunk_nchw, axis=(2, 3))                           # (B, 2048)
    vis_p = jnp.pad(vis, ((0, B_P - B), (0, 0)))

    # self.qe.embed(padded_captions): GloVe lookup, then time-major + batch pad.
    emb = jnp.transpose(params["glove_table"][padded_captions], (1, 0, 2))  # (T, B, 50)
    emb_p = jnp.pad(emb, ((0, 0), (0, B_P - B), (0, 0)))

    pk = _pack_params(params, V_P, mm_dtype)

    # ---- Phase 1: serial recurrence -> e_all (B_P, T_P, EMB_P), batch-major ----
    vmem = pl.BlockSpec(memory_space=pltpu.MemorySpace.VMEM)
    e_all = pl.pallas_call(
        _recurrence_kernel,
        out_shape=jax.ShapeDtypeStruct((B_P, T_P, EMB_P), jnp.float32),
        in_specs=[vmem] * 9,
        out_specs=vmem,
        scratch_shapes=[pltpu.VMEM((T, B_P, 4 * H_P), jnp.float32),   # xp
                        pltpu.VMEM((T, B_P, H_P), jnp.float32)],      # h_all
        compiler_params=pltpu.CompilerParams(vmem_limit_bytes=VMEM_LIMIT),
    )(vis_p, emb_p, pk["w_vis"], pk["b_vis"], pk["w_ih"], pk["w_hh"],
      pk["b_gates"], pk["w_h2e"], pk["b_h2e"])

    # ---- Phase 2: (batch, vocab)-tiled projection + time log-softmax,
    #      output already batch-major -> the wrapper only slices. ----
    out_btv = pl.pallas_call(
        functools.partial(_output_kernel, t_valid=T),
        out_shape=jax.ShapeDtypeStruct((B_P, T_P, V_P), jnp.float32),
        grid=(NB, NV),
        in_specs=[
            pl.BlockSpec((BT, T_P, EMB_P), lambda i, j: (i, 0, 0)),
            pl.BlockSpec((EMB_P, TV), lambda i, j: (0, j)),
            pl.BlockSpec((1, TV), lambda i, j: (0, j)),
        ],
        out_specs=pl.BlockSpec((BT, T_P, TV), lambda i, j: (i, 0, j)),
        compiler_params=pltpu.CompilerParams(
            dimension_semantics=("parallel", "parallel"),
            vmem_limit_bytes=VMEM_LIMIT),
    )(e_all, pk["w_out"], pk["b_out"])

    # Only slicing here — no full-array transpose of the (B, T, V) tensor.
    return out_btv[:B, :T, :V]


# --------------------------------------------------------------------------
# Pure-JAX reference (f32) for a correctness self-check
# --------------------------------------------------------------------------
def _reference_forward(cnn_trunk_nchw, padded_captions, params):
    B, T = padded_captions.shape
    vis = jnp.mean(cnn_trunk_nchw, axis=(2, 3))
    c = vis @ params["w_vis"] + params["b_vis"]
    h = jnp.zeros((B, HIDDEN), jnp.float32)
    emb = params["glove_table"][padded_captions]          # (B, T, 50)
    hs = []
    for t in range(T):
        gates = (emb[:, t, :] @ params["w_ih"] + params["b_ih"]
                 + h @ params["w_hh"] + params["b_hh"])
        i_g = jax.nn.sigmoid(gates[:, 0 * HIDDEN:1 * HIDDEN])
        f_g = jax.nn.sigmoid(gates[:, 1 * HIDDEN:2 * HIDDEN])
        g_g = jnp.tanh(gates[:, 2 * HIDDEN:3 * HIDDEN])
        o_g = jax.nn.sigmoid(gates[:, 3 * HIDDEN:4 * HIDDEN])
        c = f_g * c + i_g * g_g
        h = o_g * jnp.tanh(c)
        hs.append(h)
    hs = jnp.stack(hs)                                    # (T, B, 100)
    e = hs @ params["w_h2e"] + params["b_h2e"]            # (T, B, 50)
    logits = e @ params["w_out"] + params["b_out"]        # (T, B, V)
    logp = jax.nn.log_softmax(logits, axis=0)             # legacy implicit dim=0 (time)
    return jnp.transpose(logp, (1, 0, 2))                 # (B, T, V)


def init_params(key, vocab_size):
    """Deterministic synthetic parameters with PyTorch-default-style init
       (stored in the reference's un-padded shapes)."""
    ks = jax.random.split(key, 12)

    def u(k, shape, fan_in):
        bound = 1.0 / jnp.sqrt(float(fan_in))
        return jax.random.uniform(k, shape, jnp.float32, -bound, bound)

    return {
        # GloVe embedding table (self.qe), dim 50 to match LSTM input_size.
        "glove_table": jax.random.normal(ks[0], (vocab_size, EMB), jnp.float32) * 0.1,
        # visual_feature_embedder: Linear(2048, 100)
        "w_vis": u(ks[1], (FEAT, HIDDEN), FEAT),
        "b_vis": u(ks[2], (HIDDEN,), FEAT),
        # LSTMCell(input=50, hidden=100), weights stored transposed for x @ W
        "w_ih": u(ks[3], (EMB, 4 * HIDDEN), HIDDEN),
        "w_hh": u(ks[4], (HIDDEN, 4 * HIDDEN), HIDDEN),
        "b_ih": u(ks[5], (4 * HIDDEN,), HIDDEN),
        "b_hh": u(ks[6], (4 * HIDDEN,), HIDDEN),
        # hidden_2_embedding: Linear(100, 50)
        "w_h2e": u(ks[7], (HIDDEN, EMB), HIDDEN),
        "b_h2e": u(ks[8], (EMB,), HIDDEN),
        # output_projection[0]: Linear(50, vocab)
        "w_out": u(ks[9], (EMB, vocab_size), EMB),
        "b_out": u(ks[10], (vocab_size,), EMB),
    }


if __name__ == "__main__":
    key = jax.random.PRNGKey(0)
    k_params, k_img, k_cap = jax.random.split(key, 3)

    VOCAB = 32
    B, H, W = 2, 4, 4
    T = 8

    params = init_params(k_params, VOCAB)
    # Small stand-in for the ResNet-50 trunk output feature map (B, 2048, H, W).
    cnn_trunk = jax.random.normal(k_img, (B, FEAT, H, W), jnp.float32)
    padded_captions = jax.random.randint(k_cap, (B, T), 0, VOCAB, jnp.int32)

    out = baseline_forward(cnn_trunk, padded_captions, params)
    out = jax.block_until_ready(out)
    assert out.shape == (B, T, VOCAB), out.shape
    assert bool(jnp.all(jnp.isfinite(out)))

    # Correctness self-check against a pure-JAX f32 reference (tolerance covers
    # the optional bf16 MXU operands).
    ref = _reference_forward(cnn_trunk, padded_captions, params)
    assert bool(jnp.max(jnp.abs(out - ref)) < 5e-2)

    print("KERNEL_OK")
</pallas_src>

<mosaic_0001>
module attributes {stable_mosaic.version = 11 : i64} {
  func.func @_recurrence_kernel(%arg0: memref<8x2048xf32, #tpu.memory_space<vmem>>, %arg1: memref<8x8x50xf32, #tpu.memory_space<vmem>>, %arg2: memref<2048x128xf32, #tpu.memory_space<vmem>>, %arg3: memref<1x128xf32, #tpu.memory_space<vmem>>, %arg4: memref<50x512xbf16, #tpu.memory_space<vmem>>, %arg5: memref<128x512xf32, #tpu.memory_space<vmem>>, %arg6: memref<1x512xf32, #tpu.memory_space<vmem>>, %arg7: memref<128x128xbf16, #tpu.memory_space<vmem>>, %arg8: memref<1x128xf32, #tpu.memory_space<vmem>>, %arg9: memref<8x8x128xf32, #tpu.memory_space<vmem>>, %arg10: memref<8x8x512xf32, #tpu.memory_space<vmem>>, %arg11: memref<8x8x128xf32, #tpu.memory_space<vmem>>) attributes {dimension_semantics = [], scalar_prefetch = 0 : i64, scratch_operands = 2 : i64, tpu.core_type = #tpu.core_type<tc>} {
    %c0 = arith.constant 0 : index
    %c0_0 = arith.constant 0 : index
    %0 = vector.load %arg0[%c0, %c0_0] : memref<8x2048xf32, #tpu.memory_space<vmem>>, vector<8x2048xf32>
    %c0_1 = arith.constant 0 : index
    %c0_2 = arith.constant 0 : index
    %1 = vector.load %arg2[%c0_1, %c0_2] : memref<2048x128xf32, #tpu.memory_space<vmem>>, vector<2048x128xf32>
    %cst = arith.constant dense<0.000000e+00> : vector<8x128xf32>
    %2 = tpu.matmul %0, %1, %cst {dimension_numbers = #tpu.dot_dimension_numbers<[1], [0], [0], [1], [0, 0, 1, 1], [], []>} : vector<8x2048xf32>, vector<2048x128xf32>, vector<8x128xf32> -> vector<8x128xf32>
    %c0_3 = arith.constant 0 : index
    %c0_4 = arith.constant 0 : index
    %3 = vector.load %arg3[%c0_3, %c0_4] : memref<1x128xf32, #tpu.memory_space<vmem>>, vector<1x128xf32>
    %4 = vector.broadcast %3 : vector<1x128xf32> to vector<8x128xf32>
    %5 = arith.addf %2, %4 : vector<8x128xf32>
    %c0_5 = arith.constant 0 : index
    %c0_6 = arith.constant 0 : index
    %c0_7 = arith.constant 0 : index
    %6 = vector.load %arg1[%c0_5, %c0_6, %c0_7] : memref<8x8x50xf32, #tpu.memory_space<vmem>>, vector<8x8x50xf32>
    %7 = vector.shape_cast %6 : vector<8x8x50xf32> to vector<64x50xf32>
    %8 = arith.truncf %7 : vector<64x50xf32> to vector<64x50xbf16>
    %c0_8 = arith.constant 0 : index
    %c0_9 = arith.constant 0 : index
    %9 = vector.load %arg4[%c0_8, %c0_9] : memref<50x512xbf16, #tpu.memory_space<vmem>>, vector<50x512xbf16>
    %cst_10 = arith.constant dense<0.000000e+00> : vector<64x512xf32>
    %10 = tpu.matmul %8, %9, %cst_10 {dimension_numbers = #tpu.dot_dimension_numbers<[1], [0], [0], [1], [0, 0, 1, 1], [], []>} : vector<64x50xbf16>, vector<50x512xbf16>, vector<64x512xf32> -> vector<64x512xf32>
    %c0_11 = arith.constant 0 : index
    %c0_12 = arith.constant 0 : index
    %11 = vector.load %arg6[%c0_11, %c0_12] : memref<1x512xf32, #tpu.memory_space<vmem>>, vector<1x512xf32>
    %12 = vector.broadcast %11 : vector<1x512xf32> to vector<64x512xf32>
    %13 = arith.addf %10, %12 : vector<64x512xf32>
    %14 = vector.shape_cast %13 : vector<64x512xf32> to vector<8x8x512xf32>
    %c0_13 = arith.constant 0 : index
    %c0_14 = arith.constant 0 : index
    %c0_15 = arith.constant 0 : index
    %15 = vector.load %arg10[%c0_13, %c0_14, %c0_15] : memref<8x8x512xf32, #tpu.memory_space<vmem>>, vector<8x8x512xf32>
    tpu.vector_store %arg10[%c0_13, %c0_14, %c0_15], %14 {strides = array<i32>} : memref<8x8x512xf32, #tpu.memory_space<vmem>>, vector<8x8x512xf32>,
    %c0_16 = arith.constant 0 : index
    %c0_17 = arith.constant 0 : index
    %16 = vector.load %arg5[%c0_16, %c0_17] : memref<128x512xf32, #tpu.memory_space<vmem>>, vector<128x512xf32>
    %cst_18 = arith.constant 0.000000e+00 : f32
    %17 = vector.broadcast %cst_18 : f32 to vector<8x128xf32>
    %c0_i32 = arith.constant 0 : i32
    %c8_i32 = arith.constant 8 : i32
    %18 = arith.addi %c0_i32, %c8_i32 : i32
    %c1_i32 = arith.constant 1 : i32
    %19:2 = scf.for %arg12 = %c0_i32 to %18 step %c1_i32 iter_args(%arg13 = %17, %arg14 = %5) -> (vector<8x128xf32>, vector<8x128xf32>)  : i32 {
      %69 = arith.index_cast %arg12 : i32 to index
      %c0_45 = arith.constant 0 : index
      %c0_46 = arith.constant 0 : index
      %70 = vector.load %arg10[%69, %c0_45, %c0_46] : memref<8x8x512xf32, #tpu.memory_space<vmem>>, vector<1x8x512xf32>
      %71 = vector.shape_cast %70 : vector<1x8x512xf32> to vector<8x512xf32>
      %cst_47 = arith.constant dense<0.000000e+00> : vector<8x512xf32>
      %72 = tpu.matmul %arg13, %16, %cst_47 {dimension_numbers = #tpu.dot_dimension_numbers<[1], [0], [0], [1], [0, 0, 1, 1], [], []>} : vector<8x128xf32>, vector<128x512xf32>, vector<8x512xf32> -> vector<8x512xf32>
      %73 = arith.addf %71, %72 : vector<8x512xf32>
      %74 = vector.extract_strided_slice %73 {offsets = [0, 0], sizes = [8, 128], strides = [1, 1]} : vector<8x512xf32> to vector<8x128xf32>
      %75 = arith.negf %74 : vector<8x128xf32>
      %76 = math.exp %75 : vector<8x128xf32>
      %cst_48 = arith.constant 1.000000e+00 : f32
      %77 = vector.broadcast %cst_48 : f32 to vector<8x128xf32>
      %78 = arith.addf %77, %76 : vector<8x128xf32>
      %79 = arith.divf %77, %78 : vector<8x128xf32>
      %80 = vector.extract_strided_slice %73 {offsets = [0, 128], sizes = [8, 128], strides = [1, 1]} : vector<8x512xf32> to vector<8x128xf32>
      %81 = arith.negf %80 : vector<8x128xf32>
      %82 = math.exp %81 : vector<8x128xf32>
      %cst_49 = arith.constant 1.000000e+00 : f32
      %83 = vector.broadcast %cst_49 : f32 to vector<8x128xf32>
      %84 = arith.addf %83, %82 : vector<8x128xf32>
      %85 = arith.divf %83, %84 : vector<8x128xf32>
      %86 = vector.extract_strided_slice %73 {offsets = [0, 256], sizes = [8, 128], strides = [1, 1]} : vector<8x512xf32> to vector<8x128xf32>
      %87 = math.tanh %86 : vector<8x128xf32>
      %88 = vector.extract_strided_slice %73 {offsets = [0, 384], sizes = [8, 128], strides = [1, 1]} : vector<8x512xf32> to vector<8x128xf32>
      %89 = arith.negf %88 : vector<8x128xf32>
      %90 = math.exp %89 : vector<8x128xf32>
      %cst_50 = arith.constant 1.000000e+00 : f32
      %91 = vector.broadcast %cst_50 : f32 to vector<8x128xf32>
      %92 = arith.addf %91, %90 : vector<8x128xf32>
      %93 = arith.divf %91, %92 : vector<8x128xf32>
      %94 = arith.mulf %85, %arg14 : vector<8x128xf32>
      %95 = arith.mulf %79, %87 : vector<8x128xf32>
      %96 = arith.addf %94, %95 : vector<8x128xf32>
      %97 = math.tanh %96 : vector<8x128xf32>
      %98 = arith.mulf %93, %97 : vector<8x128xf32>
      %99 = arith.index_cast %arg12 : i32 to index
      %c0_51 = arith.constant 0 : index
      %c0_52 = arith.constant 0 : index
      %100 = vector.load %arg11[%99, %c0_51, %c0_52] : memref<8x8x128xf32, #tpu.memory_space<vmem>>, vector<1x8x128xf32>
      %101 = vector.shape_cast %100 : vector<1x8x128xf32> to vector<8x128xf32>
      %102 = vector.shape_cast %98 : vector<8x128xf32> to vector<1x8x128xf32>
      tpu.vector_store %arg11[%99, %c0_51, %c0_52], %102 {strides = array<i32>} : memref<8x8x128xf32, #tpu.memory_space<vmem>>, vector<1x8x128xf32>,
      scf.yield %98, %96 : vector<8x128xf32>, vector<8x128xf32>
    }
    %c8_i32_19 = arith.constant 8 : i32
    %c0_20 = arith.constant 0 : index
    %c0_21 = arith.constant 0 : index
    %c0_22 = arith.constant 0 : index
    %20 = vector.load %arg11[%c0_20, %c0_21, %c0_22] : memref<8x8x128xf32, #tpu.memory_space<vmem>>, vector<8x8x128xf32>
    %21 = vector.shape_cast %20 : vector<8x8x128xf32> to vector<64x128xf32>
    %22 = arith.truncf %21 : vector<64x128xf32> to vector<64x128xbf16>
    %c0_23 = arith.constant 0 : index
    %c0_24 = arith.constant 0 : index
    %23 = vector.load %arg7[%c0_23, %c0_24] : memref<128x128xbf16, #tpu.memory_space<vmem>>, vector<128x128xbf16>
    %cst_25 = arith.constant dense<0.000000e+00> : vector<64x128xf32>
    %24 = tpu.matmul %22, %23, %cst_25 {dimension_numbers = #tpu.dot_dimension_numbers<[1], [0], [0], [1], [0, 0, 1, 1], [], []>} : vector<64x128xbf16>, vector<128x128xbf16>, vector<64x128xf32> -> vector<64x128xf32>
    %c0_26 = arith.constant 0 : index
    %c0_27 = arith.constant 0 : index
    %25 = vector.load %arg8[%c0_26, %c0_27] : memref<1x128xf32, #tpu.memory_space<vmem>>, vector<1x128xf32>
    %26 = vector.broadcast %25 : vector<1x128xf32> to vector<64x128xf32>
    %27 = arith.addf %24, %26 : vector<64x128xf32>
    %28 = vector.shape_cast %27 : vector<64x128xf32> to vector<8x8x128xf32>
    %29 = vector.extract_strided_slice %28 {offsets = [0, 0, 0], sizes = [1, 8, 128], strides = [1, 1, 1]} : vector<8x8x128xf32> to vector<1x8x128xf32>
    %30 = vector.shape_cast %29 : vector<1x8x128xf32> to vector<8x128xf32>
    %c0_28 = arith.constant 0 : index
    %c0_29 = arith.constant 0 : index
    %c0_30 = arith.constant 0 : index
    %31 = vector.load %arg9[%c0_28, %c0_29, %c0_30] : memref<8x8x128xf32, #tpu.memory_space<vmem>>, vector<8x1x128xf32>
    %32 = vector.shape_cast %31 : vector<8x1x128xf32> to vector<8x128xf32>
    %33 = vector.shape_cast %30 : vector<8x128xf32> to vector<8x1x128xf32>
    tpu.vector_store %arg9[%c0_28, %c0_29, %c0_30], %33 {strides = array<i32>} : memref<8x8x128xf32, #tpu.memory_space<vmem>>, vector<8x1x128xf32>,
    %34 = vector.extract_strided_slice %28 {offsets = [1, 0, 0], sizes = [1, 8, 128], strides = [1, 1, 1]} : vector<8x8x128xf32> to vector<1x8x128xf32>
    %35 = vector.shape_cast %34 : vector<1x8x128xf32> to vector<8x128xf32>
    %c0_31 = arith.constant 0 : index
    %c1 = arith.constant 1 : index
    %c0_32 = arith.constant 0 : index
    %36 = vector.load %arg9[%c0_31, %c1, %c0_32] : memref<8x8x128xf32, #tpu.memory_space<vmem>>, vector<8x1x128xf32>
    %37 = vector.shape_cast %36 : vector<8x1x128xf32> to vector<8x128xf32>
    %38 = vector.shape_cast %35 : vector<8x128xf32> to vector<8x1x128xf32>
    tpu.vector_store %arg9[%c0_31, %c1, %c0_32], %38 {strides = array<i32>} : memref<8x8x128xf32, #tpu.memory_space<vmem>>, vector<8x1x128xf32>,
    %39 = vector.extract_strided_slice %28 {offsets = [2, 0, 0], sizes = [1, 8, 128], strides = [1, 1, 1]} : vector<8x8x128xf32> to vector<1x8x128xf32>
    %40 = vector.shape_cast %39 : vector<1x8x128xf32> to vector<8x128xf32>
    %c0_33 = arith.constant 0 : index
    %c2 = arith.constant 2 : index
    %c0_34 = arith.constant 0 : index
    %41 = vector.load %arg9[%c0_33, %c2, %c0_34] : memref<8x8x128xf32, #tpu.memory_space<vmem>>, vector<8x1x128xf32>
    %42 = vector.shape_cast %41 : vector<8x1x128xf32> to vector<8x128xf32>
    %43 = vector.shape_cast %40 : vector<8x128xf32> to vector<8x1x128xf32>
    tpu.vector_store %arg9[%c0_33, %c2, %c0_34], %43 {strides = array<i32>} : memref<8x8x128xf32, #tpu.memory_space<vmem>>, vector<8x1x128xf32>,
    %44 = vector.extract_strided_slice %28 {offsets = [3, 0, 0], sizes = [1, 8, 128], strides = [1, 1, 1]} : vector<8x8x128xf32> to vector<1x8x128xf32>
    %45 = vector.shape_cast %44 : vector<1x8x128xf32> to vector<8x128xf32>
    %c0_35 = arith.constant 0 : index
    %c3 = arith.constant 3 : index
    %c0_36 = arith.constant 0 : index
    %46 = vector.load %arg9[%c0_35, %c3, %c0_36] : memref<8x8x128xf32, #tpu.memory_space<vmem>>, vector<8x1x128xf32>
    %47 = vector.shape_cast %46 : vector<8x1x128xf32> to vector<8x128xf32>
    %48 = vector.shape_cast %45 : vector<8x128xf32> to vector<8x1x128xf32>
    tpu.vector_store %arg9[%c0_35, %c3, %c0_36], %48 {strides = array<i32>} : memref<8x8x128xf32, #tpu.memory_space<vmem>>, vector<8x1x128xf32>,
    %49 = vector.extract_strided_slice %28 {offsets = [4, 0, 0], sizes = [1, 8, 128], strides = [1, 1, 1]} : vector<8x8x128xf32> to vector<1x8x128xf32>
    %50 = vector.shape_cast %49 : vector<1x8x128xf32> to vector<8x128xf32>
    %c0_37 = arith.constant 0 : index
    %c4 = arith.constant 4 : index
    %c0_38 = arith.constant 0 : index
    %51 = vector.load %arg9[%c0_37, %c4, %c0_38] : memref<8x8x128xf32, #tpu.memory_space<vmem>>, vector<8x1x128xf32>
    %52 = vector.shape_cast %51 : vector<8x1x128xf32> to vector<8x128xf32>
    %53 = vector.shape_cast %50 : vector<8x128xf32> to vector<8x1x128xf32>
    tpu.vector_store %arg9[%c0_37, %c4, %c0_38], %53 {strides = array<i32>} : memref<8x8x128xf32, #tpu.memory_space<vmem>>, vector<8x1x128xf32>,
    %54 = vector.extract_strided_slice %28 {offsets = [5, 0, 0], sizes = [1, 8, 128], strides = [1, 1, 1]} : vector<8x8x128xf32> to vector<1x8x128xf32>
    %55 = vector.shape_cast %54 : vector<1x8x128xf32> to vector<8x128xf32>
    %c0_39 = arith.constant 0 : index
    %c5 = arith.constant 5 : index
    %c0_40 = arith.constant 0 : index
    %56 = vector.load %arg9[%c0_39, %c5, %c0_40] : memref<8x8x128xf32, #tpu.memory_space<vmem>>, vector<8x1x128xf32>
    %57 = vector.shape_cast %56 : vector<8x1x128xf32> to vector<8x128xf32>
    %58 = vector.shape_cast %55 : vector<8x128xf32> to vector<8x1x128xf32>
    tpu.vector_store %arg9[%c0_39, %c5, %c0_40], %58 {strides = array<i32>} : memref<8x8x128xf32, #tpu.memory_space<vmem>>, vector<8x1x128xf32>,
    %59 = vector.extract_strided_slice %28 {offsets = [6, 0, 0], sizes = [1, 8, 128], strides = [1, 1, 1]} : vector<8x8x128xf32> to vector<1x8x128xf32>
    %60 = vector.shape_cast %59 : vector<1x8x128xf32> to vector<8x128xf32>
    %c0_41 = arith.constant 0 : index
    %c6 = arith.constant 6 : index
    %c0_42 = arith.constant 0 : index
    %61 = vector.load %arg9[%c0_41, %c6, %c0_42] : memref<8x8x128xf32, #tpu.memory_space<vmem>>, vector<8x1x128xf32>
    %62 = vector.shape_cast %61 : vector<8x1x128xf32> to vector<8x128xf32>
    %63 = vector.shape_cast %60 : vector<8x128xf32> to vector<8x1x128xf32>
    tpu.vector_store %arg9[%c0_41, %c6, %c0_42], %63 {strides = array<i32>} : memref<8x8x128xf32, #tpu.memory_space<vmem>>, vector<8x1x128xf32>,
    %64 = vector.extract_strided_slice %28 {offsets = [7, 0, 0], sizes = [1, 8, 128], strides = [1, 1, 1]} : vector<8x8x128xf32> to vector<1x8x128xf32>
    %65 = vector.shape_cast %64 : vector<1x8x128xf32> to vector<8x128xf32>
    %c0_43 = arith.constant 0 : index
    %c7 = arith.constant 7 : index
    %c0_44 = arith.constant 0 : index
    %66 = vector.load %arg9[%c0_43, %c7, %c0_44] : memref<8x8x128xf32, #tpu.memory_space<vmem>>, vector<8x1x128xf32>
    %67 = vector.shape_cast %66 : vector<8x1x128xf32> to vector<8x128xf32>
    %68 = vector.shape_cast %65 : vector<8x128xf32> to vector<8x1x128xf32>
    tpu.vector_store %arg9[%c0_43, %c7, %c0_44], %68 {strides = array<i32>} : memref<8x8x128xf32, #tpu.memory_space<vmem>>, vector<8x1x128xf32>,
    return
  }
}

</mosaic_0001>

<bundles_post_ra>
// kernel: tpu_custom_call.1
= control target key start
LH: loop header
LB: loop body
LE: loop exit
PB: predicated region body
PF: predicated region fallthrough
CT: control target
= control target key end

     0   :  { %14 = vsyncpa [#allocation5], 0  ;;  %s3777_s0 = inlined_call_operand.hbm [shape: f32[8,2048], index: 0, kind: input, shape index: {}]   ;;  %s3778_s1 = inlined_call_operand.hbm [shape: f32[8,8,50], index: 1, kind: input, shape index: {}]   ;;  %s3779_s2 = inlined_call_operand.hbm [shape: f32[2048,128], index: 2, kind: input, shape index: {}]   ;;  %s3780_s3 = inlined_call_operand.vmem [shape: f32[1,128], index: 3, kind: input, shape index: {}]   ;;  %s3781_s4 = inlined_call_operand.hbm [shape: bf16[50,512], index: 4, kind: input, shape index: {}]   ;;  %s3782_s5 = inlined_call_operand.hbm [shape: f32[128,512], index: 5, kind: input, shape index: {}]   ;;  %s3783_s6 = inlined_call_operand.vmem [shape: f32[1,512], index: 6, kind: input, shape index: {}]   ;;  %s3784_s7 = inlined_call_operand.hbm [shape: bf16[128,128], index: 7, kind: input, shape index: {}]   ;;  %s3785_s8 = inlined_call_operand.vmem [shape: f32[1,128], index: 8, kind: input, shape index: {}]   ;;  %s3786_s9 = inlined_call_operand.hbm [shape: f32[8,8,128], index: 9, kind: output, shape index: {}]  }
   0x1   :  { %15 = vsyncpa [#allocation8], 0 }
   0x2   :  { %16 = vsyncpa [#allocation11], 0 }
   0x3   :  { %17 = vsyncpa [#allocation14], 0 }
   0x4   :  { %18 = vsyncpa [#allocation6], 0  ;;  %s3241_s30 = smov [#allocation7]   ;;  %s3053_s13 = scalar_lea.hbm %s3778_s1, 1024 }
   0x5   :  { %s34_s10 = sshll.u32 %s3241_s30, 4  ;;  %p3054_p0 = scmp.ne.s32.totalorder %s3778_s1, %s3053_s13  ;;  %s35_s10 = int_to_ptr.vmem [resolvable:$true] %s34_s10 }
   0x6   :  { %p3057_p1 = scmp.lt.u32.totalorder %s3053_s13, %s3778_s1 }
   0x8   :  { %p3059_p2 = pnand %p3057_p1, %p3054_p0 }
   0xa   :  { %3062 = shalt.err (!%p3059_p2)
}
   0xb   :  { %s3063_s18 = scalar_lea.vmem %s35_s10, 1024  ;;  %p3068_p4 = scmp.lt.s32.totalorder %s35_s10, %s35_s10 }
   0xc   :  { %p3064_p3 = scmp.ne.s32.totalorder %s35_s10, %s3063_s18  ;;  %p3069_p5 = scmp.lt.s32.totalorder %s3063_s18, %s3063_s18 }
   0xe   :  { %p3070_p6 = por %p3069_p5, %p3068_p4 }
  0x10   :  { %p3071_p7 = pnand %p3070_p6, %p3064_p3 }
  0x12   :  { %3074 = shalt.err (!%p3071_p7)
}
  0x13   :  { %s3242_s19 = smov 128   ;;  %s3243_s20 = smov 8  }
  0x14   :  { %40 = dma.hbm_to_vmem [thread:$0]  %s3778_s1, 1024, %s35_s10, [#allocation8], %s3242_s19, %s3242_s19, %s3243_s20  }
  0x15   :  { %s3244_s23 = smov [#allocation10]   ;;  %s3075_s27 = scalar_lea.hbm %s3781_s4, 1792 }
  0x16   :  { %s60_s24 = sshll.u32 %s3244_s23, 4  ;;  %p3076_p8 = scmp.ne.s32.totalorder %s3781_s4, %s3075_s27  ;;  %s61_s24 = int_to_ptr.vmem [resolvable:$true] %s60_s24 }
  0x17   :  { %p3079_p9 = scmp.lt.u32.totalorder %s3075_s27, %s3781_s4 }
  0x19   :  { %p3081_p10 = pnand %p3079_p9, %p3076_p8 }
  0x1b   :  { %3084 = shalt.err (!%p3081_p10)
}
  0x1c   :  { %s3085_s12 = scalar_lea.vmem %s61_s24, 1792  ;;  %p3090_p12 = scmp.lt.s32.totalorder %s61_s24, %s61_s24 }
  0x1d   :  { %p3086_p11 = scmp.ne.s32.totalorder %s61_s24, %s3085_s12  ;;  %p3091_p13 = scmp.lt.s32.totalorder %s3085_s12, %s3085_s12 }
  0x1f   :  { %p3092_p0 = por %p3091_p13, %p3090_p12 }
  0x21   :  { %p3093_p1 = pnand %p3092_p0, %p3086_p11 }
  0x23   :  { %3096 = shalt.err (!%p3093_p1)
}
  0x24   :  { %s3245_s1 = smov 256   ;;  %s3246_s10 = smov 16  }
  0x25   :  { %66 = dma.hbm_to_vmem [thread:$0]  %s3781_s4, 1792, %s61_s24, [#allocation11], %s3245_s1, %s3245_s1, %s3246_s10  }
  0x26   :  { %s3247_s15 = smov [#allocation4]   ;;  %s3248_s17 = smov [#allocation9]  }
  0x27   :  { %s25_s16 = sshll.u32 %s3247_s15, 4  ;;  %s46_s18 = sshll.u32 %s3248_s17, 4  ;;  %s26_s16 = int_to_ptr.vmem [resolvable:$true] %s25_s16  ;;  %s3336_s18 = int_to_ptr.vmem [resolvable:$true] %s46_s18 }
  0x28   :  { %s3097_s23 = scalar_lea.hbm %s3777_s0, 2048 }
  0x29   :  { %p3098_p2 = scmp.ne.s32.totalorder %s3777_s0, %s3097_s23  ;;  %p3101_p3 = scmp.lt.u32.totalorder %s3097_s23, %s3777_s0 }
  0x2b   :  { %p3103_p4 = pnand %p3101_p3, %p3098_p2 }
  0x2d   :  { %3106 = shalt.err (!%p3103_p4)
}
  0x2e   :  { %s3107_s4 = scalar_lea.vmem %s26_s16, 2048  ;;  %p3112_p6 = scmp.lt.s32.totalorder %s26_s16, %s26_s16 }
  0x2f   :  { %p3108_p5 = scmp.ne.s32.totalorder %s26_s16, %s3107_s4  ;;  %p3113_p7 = scmp.lt.s32.totalorder %s3107_s4, %s3107_s4 }
  0x31   :  { %p3114_p8 = por %p3113_p7, %p3112_p6 }
  0x33   :  { %p3115_p9 = pnand %p3114_p8, %p3108_p5 }
  0x35   :  { %3118 = shalt.err (!%p3115_p9)
}
  0x36   :  { %28 = dma.hbm_to_vmem [thread:$0]  %s3777_s0, 2048, %s26_s16, [#allocation5]  }
  0x37   :  { %s3119_s12 = scalar_lea.hbm %s3779_s2, 32768 }
  0x38   :  { %p3120_p10 = scmp.ne.s32.totalorder %s3779_s2, %s3119_s12  ;;  %p3123_p11 = scmp.lt.u32.totalorder %s3119_s12, %s3779_s2 }
  0x3a   :  { %p3125_p12 = pnand %p3123_p11, %p3120_p10 }
  0x3c   :  { %3128 = shalt.err (!%p3125_p12)
}
  0x3d   :  { %s3129_s15 = scalar_lea.vmem %s3336_s18, 32768  ;;  %p3134_p0 = scmp.lt.s32.totalorder %s3336_s18, %s3336_s18 }
  0x3e   :  { %p3130_p13 = scmp.ne.s32.totalorder %s3336_s18, %s3129_s15  ;;  %p3135_p1 = scmp.lt.s32.totalorder %s3129_s15, %s3129_s15 }
  0x40   :  { %p3136_p2 = por %p3135_p1, %p3134_p0 }
  0x42   :  { %p3137_p3 = pnand %p3136_p2, %p3130_p13 }
  0x44   :  { %3140 = shalt.err (!%p3137_p3)
}
  0x45   :  { %52 = dma.hbm_to_vmem [thread:$0]  %s3779_s2, 32768, %s3336_s18, [#allocation8], %s3242_s19, %s3242_s19, %s3243_s20  }
  0x46   :  { %s3249_s17 = smov [#allocation12]   ;;  %s3141_s25 = scalar_lea.hbm %s3782_s5, 8192 }
  0x47   :  { %s72_s21 = sshll.u32 %s3249_s17, 4  ;;  %p3142_p4 = scmp.ne.s32.totalorder %s3782_s5, %s3141_s25  ;;  %s73_s21 = int_to_ptr.vmem [resolvable:$true] %s72_s21 }
  0x48   :  { %p3145_p5 = scmp.lt.u32.totalorder %s3141_s25, %s3782_s5 }
  0x4a   :  { %p3147_p6 = pnand %p3145_p5, %p3142_p4 }
  0x4c   :  { %3150 = shalt.err (!%p3147_p6)
}
  0x4d   :  { %s3151_s24 = scalar_lea.vmem %s73_s21, 8192  ;;  %p3156_p8 = scmp.lt.s32.totalorder %s73_s21, %s73_s21 }
  0x4e   :  { %p3152_p7 = scmp.ne.s32.totalorder %s73_s21, %s3151_s24  ;;  %p3157_p9 = scmp.lt.s32.totalorder %s3151_s24, %s3151_s24 }
  0x50   :  { %p3158_p10 = por %p3157_p9, %p3156_p8 }
  0x52   :  { %p3159_p11 = pnand %p3158_p10, %p3152_p7 }
  0x54   :  { %3162 = shalt.err (!%p3159_p11)
}
  0x55   :  { %s3250_s2 = smov 512   ;;  %s3251_s18 = smov 32  }
  0x56   :  { %78 = dma.hbm_to_vmem [thread:$0]  %s3782_s5, 8192, %s73_s21, [#allocation11], %s3250_s2, %s3250_s2, %s3251_s18  }
  0x57   :  { %s3252_s11 = smov [#allocation13]   ;;  %s3163_s13 = scalar_lea.hbm %s3784_s7, 1024 }
  0x58   :  { %s86_s12 = sshll.u32 %s3252_s11, 4  ;;  %p3164_p12 = scmp.ne.s32.totalorder %s3784_s7, %s3163_s13  ;;  %s87_s12 = int_to_ptr.vmem [resolvable:$true] %s86_s12 }
  0x59   :  { %p3167_p13 = scmp.lt.u32.totalorder %s3163_s13, %s3784_s7 }
  0x5b   :  { %p3169_p0 = pnand %p3167_p13, %p3164_p12 }
  0x5d   :  { %3172 = shalt.err (!%p3169_p0)
}
  0x5e   :  { %s3173_s17 = scalar_lea.vmem %s87_s12, 1024  ;;  %p3178_p2 = scmp.lt.s32.totalorder %s87_s12, %s87_s12 }
  0x5f   :  { %p3174_p1 = scmp.ne.s32.totalorder %s87_s12, %s3173_s17  ;;  %p3179_p3 = scmp.lt.s32.totalorder %s3173_s17, %s3173_s17 }
  0x61   :  { %p3180_p4 = por %p3179_p3, %p3178_p2 }
  0x63   :  { %p3181_p5 = pnand %p3180_p4, %p3174_p1 }
  0x65   :  { %3184 = shalt.err (!%p3181_p5)
}
  0x66   :  { %s3253_s5 = smov 64   ;;  %s3254_s21 = smov 4  }
  0x67   :  { %92 = dma.hbm_to_vmem [thread:$0]  %s3784_s7, 1024, %s87_s12, [#allocation14], %s3253_s5, %s3253_s5, %s3254_s21  }
  0x68   :  { %3219 = dma.done.wait [#allocation5], 2048  }
  0x69   :  { %3220 = vsyncadd [#allocation5], 4294965248 }
  0x6a   :  { %3221 = dma.done.wait [#allocation8], 33792  }
  0x6b   :  { %3222 = vsyncadd [#allocation8], 4294933504 }
  0x6c   :  { %3223 = dma.done.wait [#allocation11], 9984  }
  0x6d   :  { %3224 = vsyncadd [#allocation11], 4294957312 }
  0x6e   :  { %3225 = dma.done.wait [#allocation14], 1024  }
  0x6f   :  { %3226 = vsyncadd [#allocation14], 4294966272  ;;  %v3394_v0 = vld [vmem:[#allocation12] sm:$0xff]  ;;  %v3396_v1 = vld [vmem:[#allocation12 + $0x8] sm:$0xff]  ;;  %vm1084_vm0 = vcmask 1040384   ;;  %vm1071_vm1 = vcmask 408576  }
  0x70   :  { %v3398_v2 = vld [vmem:[#allocation12 + $0x10] sm:$0xff]  ;;  %v3400_v3 = vld [vmem:[#allocation12 + $0x18] sm:$0xff]  ;;  %v3402_v4 = vld [vmem:[#allocation12 + $0x20] sm:$0xff] }
  0x71   :  { %v3404_v5 = vld [vmem:[#allocation12 + $0x28] sm:$0xff]  ;;  %v3406_v6 = vld [vmem:[#allocation12 + $0x30] sm:$0xff]  ;;  %v3408_v7 = vld [vmem:[#allocation12 + $0x38] sm:$0xff] }
  0x72   :  { %v3410_v8 = vld [vmem:[#allocation12 + $0x40] sm:$0xff]  ;;  %v3412_v9 = vld [vmem:[#allocation12 + $0x48] sm:$0xff]  ;;  %v3414_v10 = vld [vmem:[#allocation12 + $0x50] sm:$0xff] }
  0x73   :  { %v3416_v11 = vld [vmem:[#allocation12 + $0x58] sm:$0xff]  ;;  %v3418_v12 = vld [vmem:[#allocation12 + $0x60] sm:$0xff]  ;;  %v3420_v13 = vld [vmem:[#allocation12 + $0x68] sm:$0xff] }
  0x74   :  { %v3422_v14 = vld [vmem:[#allocation12 + $0x70] sm:$0xff]  ;;  %v3424_v15 = vld [vmem:[#allocation12 + $0x78] sm:$0xff]  ;;  %v3426_v16 = vld [vmem:[#allocation12 + $0x80] sm:$0xff] }
  0x75   :  { %v3428_v17 = vld [vmem:[#allocation12 + $0x88] sm:$0xff]  ;;  %v3430_v18 = vld [vmem:[#allocation12 + $0x90] sm:$0xff]  ;;  %v3432_v19 = vld [vmem:[#allocation12 + $0x98] sm:$0xff] }
  0x76   :  { %v3434_v20 = vld [vmem:[#allocation12 + $0xa0] sm:$0xff]  ;;  %v3436_v21 = vld [vmem:[#allocation12 + $0xa8] sm:$0xff]  ;;  %v3438_v22 = vld [vmem:[#allocation12 + $0xb0] sm:$0xff] }
  0x77   :  { %v3440_v23 = vld [vmem:[#allocation12 + $0xb8] sm:$0xff]  ;;  %v3442_v24 = vld [vmem:[#allocation12 + $0xc0] sm:$0xff]  ;;  %v3444_v25 = vld [vmem:[#allocation12 + $0xc8] sm:$0xff] }
  0x78   :  { %v3446_v26 = vld [vmem:[#allocation12 + $0xd0] sm:$0xff]  ;;  %v3448_v27 = vld [vmem:[#allocation12 + $0xd8] sm:$0xff]  ;;  %v3450_v28 = vld [vmem:[#allocation12 + $0xe0] sm:$0xff] }
  0x79   :  { %v3452_v29 = vld [vmem:[#allocation12 + $0xe8] sm:$0xff]  ;;  %v3454_v30 = vld [vmem:[#allocation12 + $0xf0] sm:$0xff]  ;;  %v3456_v31 = vld [vmem:[#allocation12 + $0xf8] sm:$0xff] }
  0x7a   :  { %v3458_v32 = vld [vmem:[#allocation12 + $0x100] sm:$0xff]  ;;  %v3460_v33 = vld [vmem:[#allocation12 + $0x108] sm:$0xff]  ;;  %v3462_v34 = vld [vmem:[#allocation12 + $0x110] sm:$0xff] }
  0x7b   :  { %3787 = vst [vmem:[#allocation21_spill] sm:$0xff] %v3458_v32  ;;  %3788 = vst [vmem:[#allocation22_spill] sm:$0xff] %v3462_v34  ;;  %v3464_v35 = vld [vmem:[#allocation12 + $0x118] sm:$0xff]  ;;  %v3466_v36 = vld [vmem:[#allocation12 + $0x120] sm:$0xff] }
  0x7c   :  { %3789 = vst [vmem:[#allocation23_spill] sm:$0xff] %v3466_v36  ;;  %v3468_v37 = vld [vmem:[#allocation12 + $0x128] sm:$0xff]  ;;  %v3470_v38 = vld [vmem:[#allocation12 + $0x130] sm:$0xff]  ;;  %v3472_v39 = vld [vmem:[#allocation12 + $0x138] sm:$0xff] }
  0x7d   :  { %3790 = vst [vmem:[#allocation24_spill] sm:$0xff] %v3470_v38  ;;  %3791 = vst [vmem:[#allocation25_spill] sm:$0xff] %v3472_v39  ;;  %v3474_v40 = vld [vmem:[#allocation12 + $0x140] sm:$0xff]  ;;  %v3476_v41 = vld [vmem:[#allocation12 + $0x148] sm:$0xff] }
  0x7e   :  { %3792 = vst [vmem:[#allocation26_spill] sm:$0xff] %v3474_v40  ;;  %3793 = vst [vmem:[#allocation27_spill] sm:$0xff] %v3476_v41  ;;  %v3478_v42 = vld [vmem:[#allocation12 + $0x150] sm:$0xff]  ;;  %v3480_v43 = vld [vmem:[#allocation12 + $0x158] sm:$0xff] }
  0x7f   :  { %3794 = vst [vmem:[#allocation28_spill] sm:$0xff] %v3478_v42  ;;  %3795 = vst [vmem:[#allocation29_spill] sm:$0xff] %v3480_v43  ;;  %v3482_v44 = vld [vmem:[#allocation12 + $0x160] sm:$0xff]  ;;  %v3484_v45 = vld [vmem:[#allocation12 + $0x168] sm:$0xff] }
  0x80   :  { %3796 = vst [vmem:[#allocation30_spill] sm:$0xff] %v3482_v44  ;;  %3797 = vst [vmem:[#allocation31_spill] sm:$0xff] %v3484_v45  ;;  %v3486_v46 = vld [vmem:[#allocation12 + $0x170] sm:$0xff]  ;;  %v3488_v47 = vld [vmem:[#allocation12 + $0x178] sm:$0xff] }
  0x81   :  { %3798 = vst [vmem:[#allocation32_spill] sm:$0xff] %v3486_v46  ;;  %3799 = vst [vmem:[#allocation33_spill] sm:$0xff] %v3488_v47  ;;  %v3490_v48 = vld [vmem:[#allocation12 + $0x180] sm:$0xff]  ;;  %v3492_v49 = vld [vmem:[#allocation12 + $0x188] sm:$0xff] }
  0x82   :  { %3800 = vst [vmem:[#allocation34_spill] sm:$0xff] %v3490_v48  ;;  %3801 = vst [vmem:[#allocation35_spill] sm:$0xff] %v3492_v49  ;;  %v3494_v50 = vld [vmem:[#allocation12 + $0x190] sm:$0xff]  ;;  %v3496_v51 = vld [vmem:[#allocation12 + $0x198] sm:$0xff] }
  0x83   :  { %3802 = vst [vmem:[#allocation36_spill] sm:$0xff] %v3494_v50  ;;  %3803 = vst [vmem:[#allocation37_spill] sm:$0xff] %v3496_v51  ;;  %v3498_v52 = vld [vmem:[#allocation12 + $0x1a0] sm:$0xff]  ;;  %v3500_v53 = vld [vmem:[#allocation12 + $0x1a8] sm:$0xff] }
  0x84   :  { %3804 = vst [vmem:[#allocation38_spill] sm:$0xff] %v3498_v52  ;;  %3805 = vst [vmem:[#allocation39_spill] sm:$0xff] %v3500_v53  ;;  %v3502_v54 = vld [vmem:[#allocation12 + $0x1b0] sm:$0xff]  ;;  %v3504_v55 = vld [vmem:[#allocation12 + $0x1b8] sm:$0xff] }
  0x85   :  { %3806 = vst [vmem:[#allocation40_spill] sm:$0xff] %v3502_v54  ;;  %3807 = vst [vmem:[#allocation41_spill] sm:$0xff] %v3504_v55  ;;  %v3506_v56 = vld [vmem:[#allocation12 + $0x1c0] sm:$0xff]  ;;  %v3508_v57 = vld [vmem:[#allocation12 + $0x1c8] sm:$0xff] }
  0x86   :  { %3808 = vst [vmem:[#allocation42_spill] sm:$0xff] %v3506_v56  ;;  %3809 = vst [vmem:[#allocation43_spill] sm:$0xff] %v3508_v57  ;;  %v3510_v58 = vld [vmem:[#allocation12 + $0x1d0] sm:$0xff]  ;;  %v3512_v59 = vld [vmem:[#allocation12 + $0x1d8] sm:$0xff] }
  0x87   :  { %3810 = vst [vmem:[#allocation44_spill] sm:$0xff] %v3510_v58  ;;  %3811 = vst [vmem:[#allocation45_spill] sm:$0xff] %v3512_v59  ;;  %v3514_v60 = vld [vmem:[#allocation12 + $0x1e0] sm:$0xff]  ;;  %v3516_v61 = vld [vmem:[#allocation12 + $0x1e8] sm:$0xff] }
  0x88   :  { %3812 = vst [vmem:[#allocation46_spill] sm:$0xff] %v3514_v60  ;;  %3813 = vst [vmem:[#allocation47_spill] sm:$0xff] %v3516_v61  ;;  %v3518_v62 = vld [vmem:[#allocation12 + $0x1f0] sm:$0xff]  ;;  %v3520_v63 = vld [vmem:[#allocation12 + $0x1f8] sm:$0xff] }
  0x89   :  { %3814 = vst [vmem:[#allocation48_spill] sm:$0xff] %v3518_v62  ;;  %3815 = vst [vmem:[#allocation49_spill] sm:$0xff] %v3520_v63  ;;  %v146_v50 = vld [vmem:[#allocation9 + $0x80] sm:$0xff]  ;;  %v147_v54 = vld [vmem:[#allocation9 + $0x88] sm:$0xff] }
  0x8a   :  { %v2629_v52 = vpack.c.bf16 %v147_v54, %v146_v50  ;;  %v178_v48 = vld [vmem:[#allocation9 + $0x180] sm:$0xff]  ;;  %v179_v55 = vld [vmem:[#allocation9 + $0x188] sm:$0xff]  ;;  %v148_v60 = vld [vmem:[#allocation9 + $0x90] sm:$0xff] }
  0x8b   :  { %v130_v56 = vld [vmem:[#allocation9] sm:$0xff]  ;;  %v2661_v51 = vpack.c.bf16 %v179_v55, %v178_v48  ;;  %v131_v57 = vld [vmem:[#allocation9 + $0x8] sm:$0xff]  ;;  %v149_v53 = vld [vmem:[#allocation9 + $0x98] sm:$0xff] }
  0x8c   :  { %v162_v46 = vld [vmem:[#allocation9 + $0x100] sm:$0xff]  ;;  %v163_v58 = vld [vmem:[#allocation9 + $0x108] sm:$0xff]  ;;  %2630 = vmatprep.subr.bf16.mxu0 %v2629_v52  ;;  %v2631_v59 = vpack.c.bf16 %v131_v57, %v130_v56  ;;  %v180_v61 = vld [vmem:[#allocation9 + $0x190] sm:$0xff]  ;;  %v2633_v62 = vpack.c.bf16 %v149_v53, %v148_v60 }
  0x8d   :  { %v2663_v42 = vpack.c.bf16 %v163_v58, %v162_v46  ;;  %2662 = vmatprep.subr.bf16.mxu1 %v2661_v51  ;;  %v181_v49 = vld [vmem:[#allocation9 + $0x198] sm:$0xff]  ;;  %v132_v63 = vld [vmem:[#allocation9 + $0x10] sm:$0xff]  ;;  %v150_v55 = vld [vmem:[#allocation9 + $0xa0] sm:$0xff] }
  0x8e   :  { %v133_v44 = vld [vmem:[#allocation9 + $0x18] sm:$0xff]  ;;  %2632 = vmatpush3.bf16.msra.mxu0 %v2631_v59  ;;  %v2665_v50 = vpack.c.bf16 %v181_v49, %v180_v61  ;;  %v164_v40 = vld [vmem:[#allocation9 + $0x110] sm:$0xff]  ;;  %v151_v52 = vld [vmem:[#allocation9 + $0xa8] sm:$0xff] }
  0x8f   :  { %2664 = vmatpush3.bf16.msra.mxu1 %v2663_v42  ;;  %v2635_v54 = vpack.c.bf16 %v133_v44, %v132_v63  ;;  %v165_v48 = vld [vmem:[#allocation9 + $0x118] sm:$0xff]  ;;  %2634 = vmatprep.subr.bf16.mxu0 %v2633_v62  ;;  %v182_v56 = vld [vmem:[#allocation9 + $0x1a0] sm:$0xff]  ;;  %v183_v46 = vld [vmem:[#allocation9 + $0x1a8] sm:$0xff]  ;;  %v2637_v57 = vpack.c.bf16 %v151_v52, %v150_v55 }
  0x90   :  { %v2667_v47 = vpack.c.bf16 %v165_v48, %v164_v40  ;;  %2666 = vmatprep.subr.bf16.mxu1 %v2665_v50  ;;  %v2669_v58 = vpack.c.bf16 %v183_v46, %v182_v56  ;;  %v134_v51 = vld [vmem:[#allocation9 + $0x20] sm:$0xff]  ;;  %v135_v53 = vld [vmem:[#allocation9 + $0x28] sm:$0xff]  ;;  %v152_v38 = vld [vmem:[#allocation9 + $0xb0] sm:$0xff] }
  0x91   :  { %v166_v60 = vld [vmem:[#allocation9 + $0x120] sm:$0xff]  ;;  %v167_v43 = vld [vmem:[#allocation9 + $0x128] sm:$0xff]  ;;  %v153_v59 = vld [vmem:[#allocation9 + $0xb8] sm:$0xff]  ;;  %v2639_v42 = vpack.c.bf16 %v135_v53, %v134_v51 }
  0x92   :  { %2636 = vmatpush3.bf16.msra.mxu0 %v2635_v54  ;;  %v2671_v44 = vpack.c.bf16 %v167_v43, %v166_v60  ;;  %v184_v49 = vld [vmem:[#allocation9 + $0x1b0] sm:$0xff]  ;;  %v185_v61 = vld [vmem:[#allocation9 + $0x1b8] sm:$0xff]  ;;  %v2641_v40 = vpack.c.bf16 %v153_v59, %v152_v38  ;;  %v154_v52 = vld [vmem:[#allocation9 + $0xc0] sm:$0xff] }
  0x93   :  { %2668 = vmatpush3.bf16.msra.mxu1 %v2667_v47  ;;  %v136_v62 = vld [vmem:[#allocation9 + $0x30] sm:$0xff]  ;;  %2638 = vmatprep.subr.bf16.mxu0 %v2637_v57  ;;  %v2673_v63 = vpack.c.bf16 %v185_v61, %v184_v49  ;;  %v137_v50 = vld [vmem:[#allocation9 + $0x38] sm:$0xff]  ;;  %v155_v56 = vld [vmem:[#allocation9 + $0xc8] sm:$0xff] }
  0x94   :  { %2670 = vmatprep.subr.bf16.mxu1 %v2669_v58  ;;  %v168_v48 = vld [vmem:[#allocation9 + $0x130] sm:$0xff]  ;;  %v169_v55 = vld [vmem:[#allocation9 + $0x138] sm:$0xff]  ;;  %v186_v46 = vld [vmem:[#allocation9 + $0x1c0] sm:$0xff]  ;;  %v2643_v54 = vpack.c.bf16 %v137_v50, %v136_v62  ;;  %v2645_v53 = vpack.c.bf16 %v155_v56, %v154_v52 }
  0x95   :  { %v187_v34 = vld [vmem:[#allocation9 + $0x1c8] sm:$0xff]  ;;  %v2675_v47 = vpack.c.bf16 %v169_v55, %v168_v48  ;;  %v138_v51 = vld [vmem:[#allocation9 + $0x40] sm:$0xff]  ;;  %v156_v60 = vld [vmem:[#allocation9 + $0xd0] sm:$0xff] }
  0x96   :  { %2640 = vmatpush3.bf16.msra.mxu0 %v2639_v42  ;;  %v139_v43 = vld [vmem:[#allocation9 + $0x48] sm:$0xff]  ;;  %v2677_v57 = vpack.c.bf16 %v187_v34, %v186_v46  ;;  %v170_v58 = vld [vmem:[#allocation9 + $0x140] sm:$0xff]  ;;  %v157_v59 = vld [vmem:[#allocation9 + $0xd8] sm:$0xff] }
  0x97   :  { %2672 = vmatpush3.bf16.msra.mxu1 %v2671_v44  ;;  %2642 = vmatprep.subr.bf16.mxu0 %v2641_v40  ;;  %v171_v38 = vld [vmem:[#allocation9 + $0x148] sm:$0xff]  ;;  %v188_v49 = vld [vmem:[#allocation9 + $0x1d0] sm:$0xff]  ;;  %v189_v61 = vld [vmem:[#allocation9 + $0x1d8] sm:$0xff]  ;;  %v2647_v45 = vpack.c.bf16 %v139_v43, %v138_v51  ;;  %v2649_v62 = vpack.c.bf16 %v157_v59, %v156_v60 }
  0x98   :  { %2674 = vmatprep.subr.bf16.mxu1 %v2673_v63  ;;  %v2679_v41 = vpack.c.bf16 %v171_v38, %v170_v58  ;;  %v140_v42 = vld [vmem:[#allocation9 + $0x50] sm:$0xff]  ;;  %v141_v44 = vld [vmem:[#allocation9 + $0x58] sm:$0xff]  ;;  %v2681_v50 = vpack.c.bf16 %v189_v61, %v188_v49  ;;  %v158_v48 = vld [vmem:[#allocation9 + $0xe0] sm:$0xff] }
  0x99   :  { %v172_v40 = vld [vmem:[#allocation9 + $0x150] sm:$0xff]  ;;  %v173_v63 = vld [vmem:[#allocation9 + $0x158] sm:$0xff]  ;;  %v159_v34 = vld [vmem:[#allocation9 + $0xe8] sm:$0xff]  ;;  %v2651_v46 = vpack.c.bf16 %v141_v44, %v140_v42 }
  0x9a   :  { %2644 = vmatpush3.bf16.msra.mxu0 %v2643_v54  ;;  %v190_v55 = vld [vmem:[#allocation9 + $0x1e0] sm:$0xff]  ;;  %v191_v52 = vld [vmem:[#allocation9 + $0x1e8] sm:$0xff]  ;;  %v2683_v54 = vpack.c.bf16 %v173_v63, %v172_v40  ;;  %v160_v38 = vld [vmem:[#allocation9 + $0xf0] sm:$0xff] }
  0x9b   :  { %2676 = vmatpush3.bf16.msra.mxu1 %v2675_v47  ;;  %2646 = vmatprep.subr.bf16.mxu0 %v2645_v53  ;;  %v142_v56 = vld [vmem:[#allocation9 + $0x60] sm:$0xff]  ;;  %v143_v47 = vld [vmem:[#allocation9 + $0x68] sm:$0xff]  ;;  %v2653_v53 = vpack.c.bf16 %v159_v34, %v158_v48  ;;  %v117_v60 = vld [vmem:[#allocation4 + $0x18] sm:$0xff] }
  0x9c   :  { %2678 = vmatprep.subr.bf16.mxu1 %v2677_v57  ;;  %v174_v51 = vld [vmem:[#allocation9 + $0x160] sm:$0xff]  ;;  %v115_v43 = vld [vmem:[#allocation4 + $0x8] sm:$0xff]  ;;  %v2685_v57 = vpack.c.bf16 %v191_v52, %v190_v55  ;;  %v161_v59 = vld [vmem:[#allocation9 + $0xf8] sm:$0xff]  ;;  %527 = vmatprep.mubr.f32.mxu1 %v117_v60 }
  0x9d   :  { %v175_v58 = vld [vmem:[#allocation9 + $0x168] sm:$0xff]  ;;  %v192_v49 = vld [vmem:[#allocation9 + $0x1f0] sm:$0xff]  ;;  %v193_v61 = vld [vmem:[#allocation9 + $0x1f8] sm:$0xff]  ;;  %457 = vmatprep.mubr.f32.mxu0 %v115_v43 }
  0x9e   :  { %2648 = vmatpush3.bf16.msra.mxu0 %v2647_v45  ;;  %v2687_v45 = vpack.c.bf16 %v175_v58, %v174_v51  ;;  %v144_v42 = vld [vmem:[#allocation9 + $0x70] sm:$0xff]  ;;  %v145_v44 = vld [vmem:[#allocation9 + $0x78] sm:$0xff]  ;;  %v210_v48 = vld [vmem:[#allocation9 + $0x280] sm:$0xff] }
  0x9f   :  { %2680 = vmatpush3.bf16.msra.mxu1 %v2679_v41  ;;  %2650 = vmatprep.subr.bf16.mxu0 %v2649_v62  ;;  %v2655_v41 = vpack.c.bf16 %v143_v47, %v142_v56  ;;  %v2657_v62 = vpack.c.bf16 %v161_v59, %v160_v38  ;;  %v176_v40 = vld [vmem:[#allocation9 + $0x170] sm:$0xff]  ;;  %v177_v63 = vld [vmem:[#allocation9 + $0x178] sm:$0xff]  ;;  %v211_v34 = vld [vmem:[#allocation9 + $0x288] sm:$0xff]  ;;  %v2659_v43 = vpack.c.bf16 %v145_v44, %v144_v42 }
  0xa0   :  { %2682 = vmatprep.subr.bf16.mxu1 %v2681_v50  ;;  %v2689_v50 = vpack.c.bf16 %v193_v61, %v192_v49  ;;  %v242_v55 = vld [vmem:[#allocation9 + $0x380] sm:$0xff]  ;;  %v243_v52 = vld [vmem:[#allocation9 + $0x388] sm:$0xff]  ;;  %v2691_v60 = vpack.c.bf16 %v177_v63, %v176_v40  ;;  %v2693_v56 = vpack.c.bf16 %v211_v34, %v210_v48  ;;  %v213_v58 = vld [vmem:[#allocation9 + $0x298] sm:$0xff] }
  0xa1   :  { %v2725_v47 = vpack.c.bf16 %v243_v52, %v242_v55  ;;  %v226_v51 = vld [vmem:[#allocation9 + $0x300] sm:$0xff]  ;;  %v244_v38 = vld [vmem:[#allocation9 + $0x390] sm:$0xff]  ;;  %v245_v59 = vld [vmem:[#allocation9 + $0x398] sm:$0xff] }
  0xa2   :  { %2652 = vmatpush3.bf16.msra.mxu0 %v2651_v46  ;;  %v194_v46 = vld [vmem:[#allocation9 + $0x200] sm:$0xff]  ;;  %v116_v61 = vld [vmem:[#allocation4 + $0x10] sm:$0xff]  ;;  %v197_v44 = vld [vmem:[#allocation9 + $0x218] sm:$0xff] }
  0xa3   :  { %2684 = vmatpush3.bf16.msra.mxu1 %v2683_v54  ;;  %2654 = vmatprep.subr.bf16.mxu0 %v2653_v53  ;;  %v195_v54 = vld [vmem:[#allocation9 + $0x208] sm:$0xff]  ;;  %v114_v49 = vld [vmem:[#allocation4] sm:$0xff]  ;;  %v196_v42 = vld [vmem:[#allocation9 + $0x210] sm:$0xff] }
  0xa4   :  { %2686 = vmatprep.subr.bf16.mxu1 %v2685_v57  ;;  %v227_v53 = vld [vmem:[#allocation9 + $0x308] sm:$0xff]  ;;  %v212_v57 = vld [vmem:[#allocation9 + $0x290] sm:$0xff]  ;;  %v229_v63 = vld [vmem:[#allocation9 + $0x318] sm:$0xff] }
  0xa5   :  { %v228_v40 = vld [vmem:[#allocation9 + $0x310] sm:$0xff]  ;;  %v214_v48 = vld [vmem:[#allocation9 + $0x2a0] sm:$0xff]  ;;  %v215_v34 = vld [vmem:[#allocation9 + $0x2a8] sm:$0xff] }
  0xa6   :  { %2656 = vmatpush3.bf16.msra.mxu0 %v2655_v41  ;;  %v2695_v41 = vpack.c.bf16 %v195_v54, %v194_v46  ;;  %v246_v55 = vld [vmem:[#allocation9 + $0x3a0] sm:$0xff]  ;;  %v247_v52 = vld [vmem:[#allocation9 + $0x3a8] sm:$0xff]  ;;  %v313_v32 = vld [vmem:[#allocation9 + $0x5b8] sm:$0xff] }
  0xa7   :  { %2688 = vmatpush3.bf16.msra.mxu1 %v2687_v45  ;;  %2658 = vmatprep.subr.bf16.mxu0 %v2657_v62  ;;  %v2727_v45 = vpack.c.bf16 %v227_v53, %v226_v51  ;;  %v2697_v62 = vpack.c.bf16 %v213_v58, %v212_v57  ;;  %v198_v46 = vld [vmem:[#allocation9 + $0x220] sm:$0xff]  ;;  %v199_v54 = vld [vmem:[#allocation9 + $0x228] sm:$0xff]  ;;  %v216_v57 = vld [vmem:[#allocation9 + $0x2b0] sm:$0xff] }
  0xa8   :  { %2690 = vmatprep.subr.bf16.mxu1 %v2689_v50  ;;  %v2729_v50 = vpack.c.bf16 %v245_v59, %v244_v38  ;;  %v230_v51 = vld [vmem:[#allocation9 + $0x320] sm:$0xff]  ;;  %v231_v53 = vld [vmem:[#allocation9 + $0x328] sm:$0xff]  ;;  %v217_v58 = vld [vmem:[#allocation9 + $0x2b8] sm:$0xff] }
  0xa9   :  { %v248_v38 = vld [vmem:[#allocation9 + $0x3b0] sm:$0xff]  ;;  %v249_v59 = vld [vmem:[#allocation9 + $0x3b8] sm:$0xff]  ;;  %v123_v36 = vld [vmem:[#allocation4 + $0x48] sm:$0xff] }
  0xaa   :  { %2660 = vmatpush3.bf16.msra.mxu0 %v2659_v43  ;;  %v2699_v43 = vpack.c.bf16 %v197_v44, %v196_v42  ;;  %v2705_v42 = vpack.c.bf16 %v217_v58, %v216_v57  ;;  %v2737_v44 = vpack.c.bf16 %v249_v59, %v248_v38  ;;  %v220_v57 = vld [vmem:[#allocation9 + $0x2d0] sm:$0xff]  ;;  %v221_v58 = vld [vmem:[#allocation9 + $0x2d8] sm:$0xff] }
  0xab   :  { %2692 = vmatpush3.bf16.msra.mxu1 %v2691_v60  ;;  %2694 = vmatprep.subr.bf16.mxu0 %v2693_v56  ;;  %v2731_v60 = vpack.c.bf16 %v229_v63, %v228_v40  ;;  %v2701_v56 = vpack.c.bf16 %v215_v34, %v214_v48  ;;  %v218_v40 = vld [vmem:[#allocation9 + $0x2c0] sm:$0xff]  ;;  %v219_v63 = vld [vmem:[#allocation9 + $0x2c8] sm:$0xff]  ;;  %v252_v38 = vld [vmem:[#allocation9 + $0x3d0] sm:$0xff] }
  0xac   :  { %2726 = vmatprep.subr.bf16.mxu1 %v2725_v47  ;;  %v2733_v47 = vpack.c.bf16 %v247_v52, %v246_v55  ;;  %v250_v48 = vld [vmem:[#allocation9 + $0x3c0] sm:$0xff]  ;;  %v251_v34 = vld [vmem:[#allocation9 + $0x3c8] sm:$0xff]  ;;  %v121_v52 = vld [vmem:[#allocation4 + $0x38] sm:$0xff] }
  0xad   :  { %458 = vmatmul.mubr.f32.vlgmr.msra.gmra.mrb[0].mxu0 %v114_v49  ;;  %v2703_v49 = vpack.c.bf16 %v199_v54, %v198_v46  ;;  %v119_v55 = vld [vmem:[#allocation4 + $0x28] sm:$0xff]  ;;  %v202_v46 = vld [vmem:[#allocation9 + $0x240] sm:$0xff]  ;;  %v253_v59 = vld [vmem:[#allocation9 + $0x3d8] sm:$0xff] }
  0xae   :  { %528 = vmatmul.mubr.f32.vlgmr.msra.gmra.mrb[0].mxu1 %v116_v61  ;;  %2696 = vmatpush3.bf16.msra.mxu0 %v2695_v41  ;;  %v2735_v61 = vpack.c.bf16 %v231_v53, %v230_v51  ;;  %v200_v41 = vld [vmem:[#allocation9 + $0x230] sm:$0xff]  ;;  %v203_v54 = vld [vmem:[#allocation9 + $0x248] sm:$0xff]  ;;  %v234_v51 = vld [vmem:[#allocation9 + $0x340] sm:$0xff] }
  0xaf   :  { %2728 = vmatpush3.bf16.msra.mxu1 %v2727_v45  ;;  %2698 = vmatprep.subr.bf16.mxu0 %v2697_v62  ;;  %v201_v45 = vld [vmem:[#allocation9 + $0x238] sm:$0xff]  ;;  %v232_v62 = vld [vmem:[#allocation9 + $0x330] sm:$0xff]  ;;  %v235_v53 = vld [vmem:[#allocation9 + $0x348] sm:$0xff] }
  0xb0   :  { %2730 = vmatprep.subr.bf16.mxu1 %v2729_v50  ;;  %v233_v50 = vld [vmem:[#allocation9 + $0x338] sm:$0xff]  ;;  %597 = vmatprep.mubr.f32.mxu0 %v119_v55 }
  0xb1   :  { %667 = vmatprep.mubr.f32.mxu1 %v121_v52 }
  0xb2   :  { %2700 = vmatpush3.bf16.msra.mxu0 %v2699_v43  ;;  %v2707_v43 = vpack.c.bf16 %v201_v45, %v200_v41  ;;  %v204_v41 = vld [vmem:[#allocation9 + $0x250] sm:$0xff]  ;;  %v205_v45 = vld [vmem:[#allocation9 + $0x258] sm:$0xff] }
  0xb3   :  { %2732 = vmatpush3.bf16.msra.mxu1 %v2731_v60  ;;  %2702 = vmatprep.subr.bf16.mxu0 %v2701_v56  ;;  %v2739_v60 = vpack.c.bf16 %v233_v50, %v232_v62  ;;  %v2709_v56 = vpack.c.bf16 %v219_v63, %v218_v40  ;;  %v236_v62 = vld [vmem:[#allocation9 + $0x350] sm:$0xff]  ;;  %v237_v50 = vld [vmem:[#allocation9 + $0x358] sm:$0xff]  ;;  %v222_v40 = vld [vmem:[#allocation9 + $0x2e0] sm:$0xff]  ;;  %v2715_v55 = vpack.c.bf16 %v205_v45, %v204_v41 }
  0xb4   :  { %2734 = vmatprep.subr.bf16.mxu1 %v2733_v47  ;;  %v2741_v47 = vpack.c.bf16 %v251_v34, %v250_v48  ;;  %v223_v63 = vld [vmem:[#allocation9 + $0x2e8] sm:$0xff]  ;;  %v254_v48 = vld [vmem:[#allocation9 + $0x3e0] sm:$0xff]  ;;  %v2747_v52 = vpack.c.bf16 %v237_v50, %v236_v62 }
  0xb5   :  { %v255_v34 = vld [vmem:[#allocation9 + $0x3e8] sm:$0xff]  ;;  %v274_v62 = vld [vmem:[#allocation9 + $0x480] sm:$0xff] }
  0xb6   :  { %2704 = vmatpush3.bf16.msra.mxu0 %v2703_v49  ;;  %v2711_v49 = vpack.c.bf16 %v203_v54, %v202_v46  ;;  %v2717_v46 = vpack.c.bf16 %v223_v63, %v222_v40  ;;  %v2749_v54 = vpack.c.bf16 %v255_v34, %v254_v48  ;;  %v275_v50 = vld [vmem:[#allocation9 + $0x488] sm:$0xff]  ;;  %v306_v40 = vld [vmem:[#allocation9 + $0x580] sm:$0xff] }
  0xb7   :  { %2736 = vmatpush3.bf16.msra.mxu1 %v2735_v61  ;;  %2706 = vmatprep.subr.bf16.mxu0 %v2705_v42  ;;  %v2743_v61 = vpack.c.bf16 %v235_v53, %v234_v51  ;;  %v2713_v42 = vpack.c.bf16 %v221_v58, %v220_v57  ;;  %v224_v51 = vld [vmem:[#allocation9 + $0x2f0] sm:$0xff]  ;;  %v225_v53 = vld [vmem:[#allocation9 + $0x2f8] sm:$0xff]  ;;  %v307_v63 = vld [vmem:[#allocation9 + $0x588] sm:$0xff] }
  0xb8   :  { %2738 = vmatprep.subr.bf16.mxu1 %v2737_v44  ;;  %v2745_v44 = vpack.c.bf16 %v253_v59, %v252_v38  ;;  %v256_v57 = vld [vmem:[#allocation9 + $0x3f0] sm:$0xff]  ;;  %v257_v58 = vld [vmem:[#allocation9 + $0x3f8] sm:$0xff]  ;;  %v2721_v41 = vpack.c.bf16 %v225_v53, %v224_v51 }
  0xb9   :  { %v2753_v45 = vpack.c.bf16 %v257_v58, %v256_v57  ;;  %v308_v51 = vld [vmem:[#allocation9 + $0x590] sm:$0xff]  ;;  %v309_v53 = vld [vmem:[#allocation9 + $0x598] sm:$0xff]  ;;  %v118_v57 = vld [vmem:[#allocation4 + $0x20] sm:$0xff] }
  0xba   :  { %2708 = vmatpush3.bf16.msra.mxu0 %v2707_v43  ;;  %v206_v43 = vld [vmem:[#allocation9 + $0x260] sm:$0xff]  ;;  %v120_v58 = vld [vmem:[#allocation4 + $0x30] sm:$0xff] }
  0xbb   :  { %2740 = vmatpush3.bf16.msra.mxu1 %v2739_v60  ;;  %2710 = vmatprep.subr.bf16.mxu0 %v2709_v56  ;;  %v207_v60 = vld [vmem:[#allocation9 + $0x268] sm:$0xff]  ;;  %v238_v56 = vld [vmem:[#allocation9 + $0x360] sm:$0xff] }
  0xbc   :  { %2742 = vmatprep.subr.bf16.mxu1 %v2741_v47  ;;  %v239_v47 = vld [vmem:[#allocation9 + $0x368] sm:$0xff]  ;;  %v2719_v38 = vpack.c.bf16 %v207_v60, %v206_v43  ;;  %v2757_v43 = vpack.c.bf16 %v275_v50, %v274_v62  ;;  %v2789_v60 = vpack.c.bf16 %v307_v63, %v306_v40  ;;  %v278_v62 = vld [vmem:[#allocation9 + $0x4a0] sm:$0xff] }
  0xbd   :  { %v2751_v59 = vpack.c.bf16 %v239_v47, %v238_v56  ;;  %v276_v56 = vld [vmem:[#allocation9 + $0x490] sm:$0xff]  ;;  %v277_v47 = vld [vmem:[#allocation9 + $0x498] sm:$0xff]  ;;  %v279_v50 = vld [vmem:[#allocation9 + $0x4a8] sm:$0xff] }
  0xbe   :  { %2712 = vmatpush3.bf16.msra.mxu0 %v2711_v49  ;;  %v208_v49 = vld [vmem:[#allocation9 + $0x270] sm:$0xff]  ;;  %v310_v40 = vld [vmem:[#allocation9 + $0x5a0] sm:$0xff]  ;;  %v311_v63 = vld [vmem:[#allocation9 + $0x5a8] sm:$0xff] }
  0xbf   :  { %2744 = vmatpush3.bf16.msra.mxu1 %v2743_v61  ;;  %2714 = vmatprep.subr.bf16.mxu0 %v2713_v42  ;;  %v209_v61 = vld [vmem:[#allocation9 + $0x278] sm:$0xff]  ;;  %v240_v42 = vld [vmem:[#allocation9 + $0x370] sm:$0xff] }
  0xc0   :  { %2746 = vmatprep.subr.bf16.mxu1 %v2745_v44  ;;  %v241_v44 = vld [vmem:[#allocation9 + $0x378] sm:$0xff]  ;;  %v2723_v48 = vpack.c.bf16 %v209_v61, %v208_v49  ;;  %v260_v49 = vld [vmem:[#allocation9 + $0x410] sm:$0xff] }
  0xc1   :  { %v2755_v34 = vpack.c.bf16 %v241_v44, %v240_v42  ;;  %v261_v61 = vld [vmem:[#allocation9 + $0x418] sm:$0xff]  ;;  %v292_v42 = vld [vmem:[#allocation9 + $0x510] sm:$0xff] }
  0xc2   :  { %2716 = vmatpush3.bf16.msra.mxu0 %v2715_v55  ;;  %v258_v55 = vld [vmem:[#allocation9 + $0x400] sm:$0xff]  ;;  %v293_v44 = vld [vmem:[#allocation9 + $0x518] sm:$0xff] }
  0xc3   :  { %2748 = vmatpush3.bf16.msra.mxu1 %v2747_v52  ;;  %2718 = vmatprep.subr.bf16.mxu0 %v2717_v46  ;;  %v259_v52 = vld [vmem:[#allocation9 + $0x408] sm:$0xff]  ;;  %v290_v46 = vld [vmem:[#allocation9 + $0x500] sm:$0xff] }
  0xc4   :  { %2750 = vmatprep.subr.bf16.mxu1 %v2749_v54  ;;  %v291_v54 = vld [vmem:[#allocation9 + $0x508] sm:$0xff] }
  0xc6   :  { %2720 = vmatpush3.bf16.msra.mxu0 %v2719_v38  ;;  %v2759_v38 = vpack.c.bf16 %v259_v52, %v258_v55  ;;  %v2795_v55 = vpack.c.bf16 %v293_v44, %v292_v42  ;;  %v262_v52 = vld [vmem:[#allocation9 + $0x420] sm:$0xff]  ;;  %v283_v44 = vld [vmem:[#allocation9 + $0x4c8] sm:$0xff] }
  0xc7   :  { %2752 = vmatpush3.bf16.msra.mxu1 %v2751_v59  ;;  %2722 = vmatprep.subr.bf16.mxu0 %v2721_v41  ;;  %v2791_v59 = vpack.c.bf16 %v291_v54, %v290_v46  ;;  %v2761_v41 = vpack.c.bf16 %v277_v47, %v276_v56  ;;  %v263_v46 = vld [vmem:[#allocation9 + $0x428] sm:$0xff]  ;;  %v294_v54 = vld [vmem:[#allocation9 + $0x520] sm:$0xff]  ;;  %v280_v47 = vld [vmem:[#allocation9 + $0x4b0] sm:$0xff] }
  0xc8   :  { %2754 = vmatprep.subr.bf16.mxu1 %v2753_v45  ;;  %v2793_v45 = vpack.c.bf16 %v309_v53, %v308_v51  ;;  %v295_v56 = vld [vmem:[#allocation9 + $0x528] sm:$0xff]  ;;  %v281_v51 = vld [vmem:[#allocation9 + $0x4b8] sm:$0xff]  ;;  %v312_v53 = vld [vmem:[#allocation9 + $0x5b0] sm:$0xff] }
  0xc9   :  { %v282_v42 = vld [vmem:[#allocation9 + $0x4c0] sm:$0xff] }
  0xca   :  { %2724 = vmatpush3.bf16.msra.mxu0 %v2723_v48  ;;  %v125_v48 = vld [vmem:[#allocation4 + $0x58] sm:$0xff] }
  0xcb   :  { %2756 = vmatpush3.bf16.msra.mxu1 %v2755_v34  ;;  %2758 = vmatprep.subr.bf16.mxu0 %v2757_v43  ;;  %v2763_v34 = vpack.c.bf16 %v261_v61, %v260_v49  ;;  %v2765_v43 = vpack.c.bf16 %v279_v50, %v278_v62  ;;  %v2769_v49 = vpack.c.bf16 %v281_v51, %v280_v47  ;;  %v314_v62 = vld [vmem:[#allocation9 + $0x5c0] sm:$0xff]  ;;  %v315_v50 = vld [vmem:[#allocation9 + $0x5c8] sm:$0xff]  ;;  %v268_v51 = vld [vmem:[#allocation9 + $0x450] sm:$0xff] }
  0xcc   :  { %2790 = vmatprep.subr.bf16.mxu1 %v2789_v60  ;;  %v2797_v60 = vpack.c.bf16 %v311_v63, %v310_v40  ;;  %v2801_v61 = vpack.c.bf16 %v313_v32, %v312_v53  ;;  %v266_v63 = vld [vmem:[#allocation9 + $0x440] sm:$0xff]  ;;  %v285_v32 = vld [vmem:[#allocation9 + $0x4d8] sm:$0xff] }
  0xcd   :  { %598 = vmatmul.mubr.f32.vlgmr.msra.gmra.mrb[2].mxu0 %v118_v57  ;;  %v2767_v57 = vpack.c.bf16 %v263_v46, %v262_v52  ;;  %v298_v52 = vld [vmem:[#allocation9 + $0x540] sm:$0xff]  ;;  %v299_v46 = vld [vmem:[#allocation9 + $0x548] sm:$0xff]  ;;  %v269_v53 = vld [vmem:[#allocation9 + $0x458] sm:$0xff] }
  0xce   :  { %668 = vmatmul.mubr.f32.vlgmr.msra.gmra.mrb[2].mxu1 %v120_v58  ;;  %2760 = vmatpush3.bf16.msra.mxu0 %v2759_v38  ;;  %v2799_v58 = vpack.c.bf16 %v295_v56, %v294_v54  ;;  %v264_v38 = vld [vmem:[#allocation9 + $0x430] sm:$0xff]  ;;  %v317_v54 = vld [vmem:[#allocation9 + $0x5d8] sm:$0xff]  ;;  %v2807_v47 = vpack.c.bf16 %v299_v46, %v298_v52 }
  0xcf   :  { %2792 = vmatpush3.bf16.msra.mxu1 %v2791_v59  ;;  %2762 = vmatprep.subr.bf16.mxu0 %v2761_v41  ;;  %v265_v59 = vld [vmem:[#allocation9 + $0x438] sm:$0xff]  ;;  %v296_v41 = vld [vmem:[#allocation9 + $0x530] sm:$0xff] }
  0xd0   :  { %2794 = vmatprep.subr.bf16.mxu1 %v2793_v45  ;;  %737 = vmatprep.mubr.f32.mxu0 %v123_v36  ;;  %v297_v45 = vld [vmem:[#allocation9 + $0x538] sm:$0xff]  ;;  %v2771_v36 = vpack.c.bf16 %v265_v59, %v264_v38  ;;  %v300_v38 = vld [vmem:[#allocation9 + $0x550] sm:$0xff] }
  0xd1   :  { %807 = vmatprep.mubr.f32.mxu1 %v125_v48  ;;  %v2803_v40 = vpack.c.bf16 %v297_v45, %v296_v41  ;;  %v267_v48 = vld [vmem:[#allocation9 + $0x448] sm:$0xff]  ;;  %v301_v59 = vld [vmem:[#allocation9 + $0x558] sm:$0xff]  ;;  %v318_v41 = vld [vmem:[#allocation9 + $0x5e0] sm:$0xff] }
  0xd2   :  { %2764 = vmatpush3.bf16.msra.mxu0 %v2763_v34  ;;  %v2773_v34 = vpack.c.bf16 %v283_v44, %v282_v42  ;;  %v2775_v56 = vpack.c.bf16 %v267_v48, %v266_v63  ;;  %v319_v45 = vld [vmem:[#allocation9 + $0x5e8] sm:$0xff]  ;;  %v2779_v42 = vpack.c.bf16 %v269_v53, %v268_v51  ;;  %v2811_v44 = vpack.c.bf16 %v301_v59, %v300_v38  ;;  %v302_v63 = vld [vmem:[#allocation9 + $0x560] sm:$0xff]  ;;  %v320_v52 = vld [vmem:[#allocation9 + $0x5f0] sm:$0xff] }
  0xd3   :  { %2796 = vmatpush3.bf16.msra.mxu1 %v2795_v55  ;;  %2766 = vmatprep.subr.bf16.mxu0 %v2765_v43  ;;  %v2805_v55 = vpack.c.bf16 %v315_v50, %v314_v62  ;;  %v284_v43 = vld [vmem:[#allocation9 + $0x4d0] sm:$0xff]  ;;  %v270_v62 = vld [vmem:[#allocation9 + $0x460] sm:$0xff]  ;;  %v271_v50 = vld [vmem:[#allocation9 + $0x468] sm:$0xff] }
  0xd4   :  { %2798 = vmatprep.subr.bf16.mxu1 %v2797_v60  ;;  %v316_v60 = vld [vmem:[#allocation9 + $0x5d0] sm:$0xff]  ;;  %v303_v48 = vld [vmem:[#allocation9 + $0x568] sm:$0xff]  ;;  %v321_v46 = vld [vmem:[#allocation9 + $0x5f8] sm:$0xff] }
  0xd5   :  { %v2817_v53 = vpack.c.bf16 %v321_v46, %v320_v52  ;;  %v370_v38 = vld [vmem:[#allocation9 + $0x780] sm:$0xff]  ;;  %v371_v59 = vld [vmem:[#allocation9 + $0x788] sm:$0xff]  ;;  %v324_v52 = vld [vmem:[#allocation9 + $0x610] sm:$0xff] }
  0xd6   :  { %2768 = vmatpush3.bf16.msra.mxu0 %v2767_v57  ;;  %v2777_v57 = vpack.c.bf16 %v285_v32, %v284_v43  ;;  %v272_v43 = vld [vmem:[#allocation9 + $0x470] sm:$0xff]  ;;  %v2783_v32 = vpack.c.bf16 %v271_v50, %v270_v62 }
  0xd7   :  { %2800 = vmatpush3.bf16.msra.mxu1 %v2799_v58  ;;  %2770 = vmatprep.subr.bf16.mxu0 %v2769_v49  ;;  %v2809_v58 = vpack.c.bf16 %v317_v54, %v316_v60  ;;  %v286_v49 = vld [vmem:[#allocation9 + $0x4e0] sm:$0xff]  ;;  %v2815_v60 = vpack.c.bf16 %v303_v48, %v302_v63  ;;  %v273_v54 = vld [vmem:[#allocation9 + $0x478] sm:$0xff]  ;;  %v340_v62 = vld [vmem:[#allocation9 + $0x690] sm:$0xff] }
  0xd8   :  { %2802 = vmatprep.subr.bf16.mxu1 %v2801_v61  ;;  %v287_v61 = vld [vmem:[#allocation9 + $0x4e8] sm:$0xff]  ;;  %v372_v63 = vld [vmem:[#allocation9 + $0x790] sm:$0xff]  ;;  %v122_v48 = vld [vmem:[#allocation4 + $0x40] sm:$0xff] }
  0xda   :  { %2772 = vmatpush3.bf16.msra.mxu0 %v2771_v36  ;;  %v2781_v36 = vpack.c.bf16 %v287_v61, %v286_v49  ;;  %v322_v49 = vld [vmem:[#allocation9 + $0x600] sm:$0xff]  ;;  %v323_v61 = vld [vmem:[#allocation9 + $0x608] sm:$0xff] }
  0xdb   :  { %2804 = vmatpush3.bf16.msra.mxu1 %v2803_v40  ;;  %2774 = vmatprep.subr.bf16.mxu0 %v2773_v34  ;;  %v2813_v40 = vpack.c.bf16 %v319_v45, %v318_v41  ;;  %v288_v34 = vld [vmem:[#allocation9 + $0x4f0] sm:$0xff]  ;;  %v354_v41 = vld [vmem:[#allocation9 + $0x700] sm:$0xff]  ;;  %v2787_v45 = vpack.c.bf16 %v273_v54, %v272_v43  ;;  %v2823_v46 = vpack.c.bf16 %v323_v61, %v322_v49 }
  0xdc   :  { %2806 = vmatprep.subr.bf16.mxu1 %v2805_v55  ;;  %v289_v55 = vld [vmem:[#allocation9 + $0x4f8] sm:$0xff]  ;;  %v326_v61 = vld [vmem:[#allocation9 + $0x620] sm:$0xff] }
  0xdd   :  { %v2785_v51 = vpack.c.bf16 %v289_v55, %v288_v34  ;;  %v124_v34 = vld [vmem:[#allocation4 + $0x50] sm:$0xff]  ;;  %v373_v55 = vld [vmem:[#allocation9 + $0x798] sm:$0xff] }
  0xde   :  { %2776 = vmatpush3.bf16.msra.mxu0 %v2775_v56  ;;  %v304_v56 = vld [vmem:[#allocation9 + $0x570] sm:$0xff]  ;;  %v2857_v54 = vpack.c.bf16 %v373_v55, %v372_v63  ;;  %v377_v63 = vld [vmem:[#allocation9 + $0x7b8] sm:$0xff] }
  0xdf   :  { %2808 = vmatpush3.bf16.msra.mxu1 %v2807_v47  ;;  %2778 = vmatprep.subr.bf16.mxu0 %v2777_v57  ;;  %v305_v47 = vld [vmem:[#allocation9 + $0x578] sm:$0xff]  ;;  %v338_v57 = vld [vmem:[#allocation9 + $0x680] sm:$0xff] }
  0xe0   :  { %2810 = vmatprep.subr.bf16.mxu1 %v2809_v58  ;;  %v339_v58 = vld [vmem:[#allocation9 + $0x688] sm:$0xff]  ;;  %v329_v55 = vld [vmem:[#allocation9 + $0x638] sm:$0xff] }
  0xe1   :  { %v2821_v50 = vpack.c.bf16 %v339_v58, %v338_v57  ;;  %v375_v57 = vld [vmem:[#allocation9 + $0x7a8] sm:$0xff] }
  0xe2   :  { %2780 = vmatpush3.bf16.msra.mxu0 %v2779_v42  ;;  %v2819_v42 = vpack.c.bf16 %v305_v47, %v304_v56  ;;  %v357_v56 = vld [vmem:[#allocation9 + $0x718] sm:$0xff]  ;;  %v342_v47 = vld [vmem:[#allocation9 + $0x6a0] sm:$0xff]  ;;  %v127_v58 = vld [vmem:[#allocation4 + $0x68] sm:$0xff] }
  0xe3   :  { %2812 = vmatpush3.bf16.msra.mxu1 %v2811_v44  ;;  %2782 = vmatprep.subr.bf16.mxu0 %v2781_v36  ;;  %v355_v44 = vld [vmem:[#allocation9 + $0x708] sm:$0xff]  ;;  %v2853_v36 = vpack.c.bf16 %v371_v59, %v370_v38  ;;  %v129_v38 = vld [vmem:[#allocation4 + $0x78] sm:$0xff] }
  0xe4   :  { %2814 = vmatprep.subr.bf16.mxu1 %v2813_v40  ;;  %v341_v40 = vld [vmem:[#allocation9 + $0x698] sm:$0xff]  ;;  %v2855_v39 = vpack.c.bf16 %v355_v44, %v354_v41  ;;  %v327_v41 = vld [vmem:[#allocation9 + $0x628] sm:$0xff]  ;;  %v358_v44 = vld [vmem:[#allocation9 + $0x720] sm:$0xff] }
  0xe5   :  { %v2825_v43 = vpack.c.bf16 %v341_v40, %v340_v62  ;;  %v359_v62 = vld [vmem:[#allocation9 + $0x728] sm:$0xff]  ;;  %v376_v40 = vld [vmem:[#allocation9 + $0x7b0] sm:$0xff] }
  0xe6   :  { %2784 = vmatpush3.bf16.msra.mxu0 %v2783_v32  ;;  %v325_v32 = vld [vmem:[#allocation9 + $0x618] sm:$0xff] }
  0xe7   :  { %2816 = vmatpush3.bf16.msra.mxu1 %v2815_v60  ;;  %2786 = vmatprep.subr.bf16.mxu0 %v2785_v51  ;;  %v356_v60 = vld [vmem:[#allocation9 + $0x710] sm:$0xff]  ;;  %v343_v51 = vld [vmem:[#allocation9 + $0x6a8] sm:$0xff]  ;;  %v2827_v59 = vpack.c.bf16 %v325_v32, %v324_v52 }
  0xe8   :  { %2818 = vmatprep.subr.bf16.mxu1 %v2817_v53  ;;  %v374_v53 = vld [vmem:[#allocation9 + $0x7a0] sm:$0xff]  ;;  %v2859_v49 = vpack.c.bf16 %v357_v56, %v356_v60  ;;  %v360_v32 = vld [vmem:[#allocation9 + $0x730] sm:$0xff]  ;;  %v361_v60 = vld [vmem:[#allocation9 + $0x738] sm:$0xff] }
  0xe9   :  { %v378_v56 = vld [vmem:[#allocation9 + $0x7c0] sm:$0xff] }
  0xea   :  { %2788 = vmatpush3.bf16.msra.mxu0 %v2787_v45  ;;  %v2829_v45 = vpack.c.bf16 %v343_v51, %v342_v47  ;;  %v379_v47 = vld [vmem:[#allocation9 + $0x7c8] sm:$0xff] }
  0xeb   :  { %2820 = vmatpush3.bf16.msra.mxu1 %v2819_v42  ;;  %2822 = vmatprep.subr.bf16.mxu0 %v2821_v50  ;;  %v2861_v42 = vpack.c.bf16 %v375_v57, %v374_v53  ;;  %v344_v50 = vld [vmem:[#allocation9 + $0x6b0] sm:$0xff]  ;;  %v2867_v53 = vpack.c.bf16 %v361_v60, %v360_v32  ;;  %v330_v57 = vld [vmem:[#allocation9 + $0x640] sm:$0xff]  ;;  %v383_v32 = vld [vmem:[#allocation9 + $0x7e8] sm:$0xff] }
  0xec   :  { %2854 = vmatprep.subr.bf16.mxu1 %v2853_v36  ;;  %v345_v36 = vld [vmem:[#allocation9 + $0x6b8] sm:$0xff] }
  0xed   :  { %738 = vmatmul.mubr.f32.vlgmr.msra.gmra.mrb[4].mxu0 %v122_v48  ;;  %v2831_v48 = vpack.c.bf16 %v327_v41, %v326_v61  ;;  %v2833_v52 = vpack.c.bf16 %v345_v36, %v344_v50  ;;  %v363_v61 = vld [vmem:[#allocation9 + $0x748] sm:$0xff]  ;;  %v348_v41 = vld [vmem:[#allocation9 + $0x6d0] sm:$0xff] }
  0xee   :  { %808 = vmatmul.mubr.f32.vlgmr.msra.gmra.mrb[4].mxu1 %v124_v34  ;;  %2824 = vmatpush3.bf16.msra.mxu0 %v2823_v46  ;;  %v328_v34 = vld [vmem:[#allocation9 + $0x630] sm:$0xff]  ;;  %v2865_v46 = vpack.c.bf16 %v377_v63, %v376_v40  ;;  %v333_v40 = vld [vmem:[#allocation9 + $0x658] sm:$0xff] }
  0xef   :  { %2856 = vmatpush3.bf16.msra.mxu1 %v2855_v39  ;;  %2826 = vmatprep.subr.bf16.mxu0 %v2825_v43  ;;  %v2863_v39 = vpack.c.bf16 %v359_v62, %v358_v44  ;;  %v346_v43 = vld [vmem:[#allocation9 + $0x6c0] sm:$0xff]  ;;  %v2835_v51 = vpack.c.bf16 %v329_v55, %v328_v34  ;;  %v381_v44 = vld [vmem:[#allocation9 + $0x7d8] sm:$0xff]  ;;  %v332_v36 = vld [vmem:[#allocation9 + $0x650] sm:$0xff] }
  0xf0   :  { %2858 = vmatprep.subr.bf16.mxu1 %v2857_v54  ;;  %877 = vmatprep.mubr.f32.mxu0 %v127_v58  ;;  %v347_v54 = vld [vmem:[#allocation9 + $0x6c8] sm:$0xff]  ;;  %v365_v34 = vld [vmem:[#allocation9 + $0x758] sm:$0xff]  ;;  %v350_v55 = vld [vmem:[#allocation9 + $0x6e0] sm:$0xff]  ;;  %v2843_v60 = vpack.c.bf16 %v333_v40, %v332_v36 }
  0xf1   :  { %947 = vmatprep.mubr.f32.mxu1 %v129_v38  ;;  %v331_v58 = vld [vmem:[#allocation9 + $0x648] sm:$0xff]  ;;  %v2837_v38 = vpack.c.bf16 %v347_v54, %v346_v43  ;;  %v334_v54 = vld [vmem:[#allocation9 + $0x660] sm:$0xff]  ;;  %v369_v36 = vld [vmem:[#allocation9 + $0x778] sm:$0xff] }
  0xf2   :  { %2828 = vmatpush3.bf16.msra.mxu0 %v2827_v59  ;;  %v2869_v59 = vpack.c.bf16 %v379_v47, %v378_v56  ;;  %v2839_v62 = vpack.c.bf16 %v331_v58, %v330_v57  ;;  %v335_v56 = vld [vmem:[#allocation9 + $0x668] sm:$0xff]  ;;  %v352_v58 = vld [vmem:[#allocation9 + $0x6f0] sm:$0xff] }
  0xf3   :  { %2860 = vmatpush3.bf16.msra.mxu1 %v2859_v49  ;;  %2830 = vmatprep.subr.bf16.mxu0 %v2829_v45  ;;  %v362_v49 = vld [vmem:[#allocation9 + $0x740] sm:$0xff]  ;;  %v349_v45 = vld [vmem:[#allocation9 + $0x6d8] sm:$0xff]  ;;  %v367_v57 = vld [vmem:[#allocation9 + $0x768] sm:$0xff] }
  0xf4   :  { %2862 = vmatprep.subr.bf16.mxu1 %v2861_v42  ;;  %v380_v42 = vld [vmem:[#allocation9 + $0x7d0] sm:$0xff]  ;;  %v2871_v50 = vpack.c.bf16 %v363_v61, %v362_v49  ;;  %v2841_v63 = vpack.c.bf16 %v349_v45, %v348_v41  ;;  %v385_v49 = vld [vmem:[#allocation9 + $0x7f8] sm:$0xff]  ;;  %v2847_v61 = vpack.c.bf16 %v335_v56, %v334_v54 }
  0xf5   :  { %v336_v45 = vld [vmem:[#allocation9 + $0x670] sm:$0xff]  ;;  %v3016_v54 = vld [vmem:[#allocation10 + $0x28] ss:$16 sps:$4 sm:$0xff]  }
  0xf6   :  { %2832 = vmatpush3.bf16.msra.mxu0 %v2831_v48  ;;  %v2873_v48 = vpack.c.bf16 %v381_v44, %v380_v42  ;;  %v3021_v56 = vld [vmem:[#allocation10 + $0x44] ss:$16 sps:$4 sm:$0xff]  }
  0xf7   :  { %2864 = vmatpush3.bf16.msra.mxu1 %v2863_v39  ;;  %2834 = vmatprep.subr.bf16.mxu0 %v2833_v52  ;;  %v364_v39 = vld [vmem:[#allocation9 + $0x750] sm:$0xff]  ;;  %v351_v52 = vld [vmem:[#allocation9 + $0x6e8] sm:$0xff] }
  0xf8   :  { %2866 = vmatprep.subr.bf16.mxu1 %v2865_v46  ;;  %v382_v46 = vld [vmem:[#allocation9 + $0x7e0] sm:$0xff]  ;;  %v2875_v43 = vpack.c.bf16 %v365_v34, %v364_v39  ;;  %v2845_v47 = vpack.c.bf16 %v351_v52, %v350_v55  ;;  %v3012_v39 = vld [vmem:[#allocation10 + $0xc] ss:$16 sps:$4 sm:$0xff]   ;;  %v128_v55 = vld [vmem:[#allocation4 + $0x70] sm:$0xff] }
  0xf9   :  { %v126_v34 = vld [vmem:[#allocation4 + $0x60] sm:$0xff] }
  0xfa   :  { %2836 = vmatpush3.bf16.msra.mxu0 %v2835_v51  ;;  %v2877_v51 = vpack.c.bf16 %v383_v32, %v382_v46  ;;  %v3007_v52 = vld [vmem:[#allocation10] ss:$16 sps:$4 sm:$0xff]   ;;  %v3010_v46 = vld [vmem:[#allocation10 + $0x8] ss:$16 sps:$4 sm:$0xff]   ;;  %v3015_v32 = vld [vmem:[#allocation10 + $0x24] ss:$16 sps:$4 sm:$0xff]  }
  0xfb   :  { %2868 = vmatpush3.bf16.msra.mxu1 %v2867_v53  ;;  %2838 = vmatprep.subr.bf16.mxu0 %v2837_v38  ;;  %v366_v53 = vld [vmem:[#allocation9 + $0x760] sm:$0xff]  ;;  %v353_v38 = vld [vmem:[#allocation9 + $0x6f8] sm:$0xff] }
  0xfc   :  { %2870 = vmatprep.subr.bf16.mxu1 %v2869_v59  ;;  %v384_v59 = vld [vmem:[#allocation9 + $0x7f0] sm:$0xff]  ;;  %v2879_v41 = vpack.c.bf16 %v367_v57, %v366_v53  ;;  %v2849_v42 = vpack.c.bf16 %v353_v38, %v352_v58  ;;  %v978_v53 = vld [vmem:[#allocation10 + $0x68] sm:$0x11]  ;;  %v3255_v57 = vmov 0  }
  0xfd   :  { %v2881_v44 = vpack.c.bf16 %v385_v49, %v384_v59  ;;  %v3019_v58 = vld [vmem:[#allocation10 + $0x40] ss:$16 sps:$4 sm:$0xff]   ;;  %v3022_v38 = vld [vmem:[#allocation10 + $0x48] ss:$16 sps:$4 sm:$0xff]   ;;  %v2254_v49 = vcombine.high %v978_v53, %v978_v53 }
  0xfe   :  { %2840 = vmatpush3.bf16.msra.mxu0 %v2839_v62  ;;  %v337_v62 = vld [vmem:[#allocation9 + $0x678] sm:$0xff] }
  0xff   :  { %2872 = vmatpush3.bf16.msra.mxu1 %v2871_v50  ;;  %2842 = vmatprep.subr.bf16.mxu0 %v2841_v63  ;;  %v368_v50 = vld [vmem:[#allocation9 + $0x770] sm:$0xff]  ;;  %v2851_v40 = vpack.c.bf16 %v337_v62, %v336_v45  ;;  %v953_v45 = vld [vmem:[#allocation7] sm:$0xff] }
 0x100   :  { %2874 = vmatprep.subr.bf16.mxu1 %v2873_v48  ;;  %v2883_v63 = vpack.c.bf16 %v369_v36, %v368_v50  ;;  %v3009_v48 = vld [vmem:[#allocation10 + $0x4] ss:$16 sps:$4 sm:$0xff]  }
 0x101   :  { %v955_v36 = vld [vmem:[#allocation7 + $0x10] sm:$0xff] }
 0x102   :  { %2844 = vmatpush3.bf16.msra.mxu0 %v2843_v60  ;;  %v3018_v60 = vld [vmem:[#allocation10 + $0x2c] ss:$16 sps:$4 sm:$0xff]  }
 0x103   :  { %2876 = vmatpush3.bf16.msra.mxu1 %v2875_v43  ;;  %2846 = vmatprep.subr.bf16.mxu0 %v2845_v47  ;;  %v3013_v43 = vld [vmem:[#allocation10 + $0x20] ss:$16 sps:$4 sm:$0xff]   ;;  %v3024_v47 = vld [vmem:[#allocation10 + $0x4c] ss:$16 sps:$4 sm:$0xff]  }
 0x104   :  { %2878 = vmatprep.subr.bf16.mxu1 %v2877_v51  ;;  %v977_v51 = vld [vmem:[#allocation10 + $0x60] sm:$0x11] }
 0x105   :  { %v2252_v59 = vcombine.high %v977_v51, %v977_v51 }
 0x106   :  { %2848 = vmatpush3.bf16.msra.mxu0 %v2847_v61  ;;  %v2251_v61 = vcombine.low %v977_v51, %v977_v51 }
 0x107   :  { %2880 = vmatpush3.bf16.msra.mxu1 %v2879_v41  ;;  %2850 = vmatprep.subr.bf16.mxu0 %v2849_v42  ;;  %v2253_v41 = vcombine.low %v978_v53, %v978_v53  ;;  %v954_v42 = vld [vmem:[#allocation7 + $0x8] sm:$0xff] }
 0x108   :  { %2882 = vmatprep.subr.bf16.mxu1 %v2881_v44  ;;  %v1086_v44 = vsel %vm1084_vm0, %v2251_v61, 0  ;;  %v961_v50 = vpack.c.bf16 %v954_v42, %v953_v45 }
 0x109   :  { %v1092_v62 = vsel %vm1084_vm0, %v2253_v41, 0 }
 0x10a   :  { %2852 = vmatpush3.bf16.msra.mxu0 %v2851_v40  ;;  %v956_v40 = vld [vmem:[#allocation7 + $0x18] sm:$0xff] }
 0x10b   :  { %2884 = vmatpush3.bf16.msra.mxu1 %v2883_v63  ;;  %1097 = vmatprep.subr.bf16.mxu0 %v3009_v48  ;;  %v962_v63 = vpack.c.bf16 %v956_v40, %v955_v36  ;;  %v957_v48 = vld [vmem:[#allocation7 + $0x20] sm:$0xff] }
 0x10c   :  { %1170 = vmatprep.subr.bf16.mxu1 %v3012_v39  ;;  %v958_v39 = vld [vmem:[#allocation7 + $0x28] sm:$0xff] }
 0x10d   :  { %878 = vmatmul.mubr.f32.vlgmr.msra.gmra.mrb[6].mxu0 %v126_v34  ;;  %v963_v34 = vpack.c.bf16 %v958_v39, %v957_v48 }
 0x10e   :  { %948 = vmatmul.mubr.f32.vlgmr.msra.gmra.mrb[6].mxu1 %v128_v55  ;;  %1098 = vmatpush1.bf16.msra.mxu0 %v3007_v52  ;;  %v959_v55 = vld [vmem:[#allocation7 + $0x30] sm:$0xff]  ;;  %v960_v52 = vld [vmem:[#allocation7 + $0x38] sm:$0xff] }
 0x10f   :  { %1171 = vmatpush1.bf16.msra.mxu1 %v3010_v46  ;;  %1099 = vmatprep.subr.bf16.mxu0 %v3015_v32  ;;  %v964_v46 = vpack.c.bf16 %v960_v52, %v959_v55 }
 0x110   :  { %1172 = vmatprep.subr.bf16.mxu1 %v3018_v60  ;;  %1129 = vmatprep.mubr.bf16.mxu0 %v3255_v57 }
 0x111   :  { %1202 = vmatprep.mubr.bf16.mxu1 %v3255_v57 }
 0x112   :  { %1100 = vmatpush1.bf16.msra.mxu0 %v3013_v43  ;;  %v2238_v43 = vld [vmem:[%s3780_s3] ss:$0 sm:$0xff] }
 0x113   :  { %1173 = vmatpush1.bf16.msra.mxu1 %v3016_v54  ;;  %1101 = vmatprep.subr.bf16.mxu0 %v3021_v56 }
 0x114   :  { %1174 = vmatprep.subr.bf16.mxu1 %v3024_v47 }
 0x116   :  { %1102 = vmatpush1.bf16.msra.mxu0 %v3019_v58 }
 0x117   :  { %1175 = vmatpush1.bf16.msra.mxu1 %v3022_v38  ;;  %2255 = vmatprep.subr.msk.bf16.mxu0 %vm1084_vm0, %v2252_v59 }
 0x118   :  { %2260 = vmatprep.subr.msk.bf16.mxu1 %vm1084_vm0, %v2254_v49 }
 0x11a   :  { %1104 = vmatpush1.bf16.msra.mxu0 %v1086_v44 }
 0x11b   :  { %1177 = vmatpush1.bf16.msra.mxu1 %v1092_v62 }
 0x11d   :  { %2256 = vmatmul.mubr.msk.bf16.vlgmr.msra.gmra.mrb[8].mxu0 %vm1071_vm1, %v961_v50 }
 0x11e   :  { %2261 = vmatmul.mubr.msk.bf16.vlgmr.msra.gmra.mrb[8].mxu1 %vm1071_vm1, %v961_v50  ;;  %1139 = vmatprep.mubr.bf16.mxu0 %v3255_v57 }
 0x11f   :  { %1212 = vmatprep.mubr.bf16.mxu1 %v3255_v57 }
 0x125   :  { %2257 = vmatmul.mubr.msk.bf16.gmra.mrb[12].mxu0 %vm1071_vm1, %v962_v63 }
 0x126   :  { %2262 = vmatmul.mubr.msk.bf16.gmra.mrb[12].mxu1 %vm1071_vm1, %v962_v63  ;;  %1149 = vmatprep.mubr.bf16.mxu0 %v3255_v57 }
 0x127   :  { %1222 = vmatprep.mubr.bf16.mxu1 %v3255_v57 }
 0x12d   :  { %2258 = vmatmul.mubr.msk.bf16.gmra.mrb[16].mxu0 %vm1071_vm1, %v963_v34 }
 0x12e   :  { %2263 = vmatmul.mubr.msk.bf16.gmra.mrb[16].mxu1 %vm1071_vm1, %v963_v34  ;;  %1159 = vmatprep.mubr.bf16.mxu0 %v3255_v57 }
 0x12f   :  { %1232 = vmatprep.mubr.bf16.mxu1 %v3255_v57 }
 0x135   :  { %2259 = vmatmul.mubr.msk.bf16.gmra.mrb[20].mxu0 %vm1071_vm1, %v964_v46 }
 0x136   :  { %2264 = vmatmul.mubr.msk.bf16.gmra.mrb[20].mxu1 %vm1071_vm1, %v964_v46 }
 0x180   :  { %v2345_v32 = vpop.f32.mrb[0].mxu0 }
 0x181   :  { %v2380_v60 = vpop.f32.mrb[0].mxu1  ;;  %v2346_v54 = vpop.f32.mrb[1].mxu0 }
 0x182   :  { %v2381_v56 = vpop.f32.mrb[1].mxu1  ;;  %v2347_v47 = vadd.f32 %v2346_v54, %v2345_v32  ;;  %v981_v32 = vlaneseq }
 0x183   :  { %v2382_v51 = vadd.f32 %v2381_v56, %v2380_v60 }
 0x184   :  { %v460_v53 = vadd.f32 %v2347_v47, %v2238_v43  ;;  %v3533_v56 = vshrl.u32 %v981_v32, 7 }
 0x186   :  { %v530_v58 = vadd.f32 %v2382_v51, %v460_v53  ;;  %v983_v51 = vsub.s32 0, %v3533_v56  ;;  %v991_v53 = vsub.s32 2, %v3533_v56 }
 0x1a0   :  { %v2415_v57 = vpop.f32.mrb[2].mxu0 }
 0x1a1   :  { %v2450_v38 = vpop.f32.mrb[2].mxu1  ;;  %v2416_v59 = vpop.f32.mrb[3].mxu0 }
 0x1a2   :  { %v2451_v49 = vpop.f32.mrb[3].mxu1  ;;  %v2417_v61 = vadd.f32 %v2416_v59, %v2415_v57  ;;  %v987_v57 = vsub.s32 1, %v3533_v56 }
 0x1a3   :  { %v2452_v41 = vadd.f32 %v2451_v49, %v2450_v38  ;;  %v995_v38 = vsub.s32 3, %v3533_v56 }
 0x1a4   :  { %v600_v45 = vadd.f32 %v2417_v61, %v530_v58  ;;  %v979_v58 = vld [vmem:[%s3783_s6] sm:$0xf]  ;;  %s3589_s6 = smov 0  }
 0x1a5   :  { %v3544_v59 = vrot.slane %v979_v58, %v983_v51  ;;  %v3546_v49 = vrot.slane %v979_v58, %v991_v53  ;;  %v3548_v61 = vrot.slane %v979_v58, %v987_v57 }
 0x1a6   :  { %v670_v42 = vadd.f32 %v2452_v41, %v600_v45  ;;  %v3550_v41 = vrot.slane %v979_v58, %v995_v38 }
 0x1c0   :  { %v2485_v44 = vpop.f32.mrb[4].mxu0 }
 0x1c1   :  { %v2520_v62 = vpop.f32.mrb[4].mxu1  ;;  %v2486_v50 = vpop.f32.mrb[5].mxu0 }
 0x1c2   :  { %v2521_v36 = vpop.f32.mrb[5].mxu1  ;;  %v2487_v40 = vadd.f32 %v2486_v50, %v2485_v44 }
 0x1c3   :  { %v2522_v63 = vadd.f32 %v2521_v36, %v2520_v62 }
 0x1c4   :  { %v740_v48 = vadd.f32 %v2487_v40, %v670_v42 }
 0x1c6   :  { %v810_v39 = vadd.f32 %v2522_v63, %v740_v48 }
 0x1e0   :  { %v2555_v34 = vpop.f32.mrb[6].mxu0 }
 0x1e1   :  { %v2590_v55 = vpop.f32.mrb[6].mxu1  ;;  %v2556_v52 = vpop.f32.mrb[7].mxu0 }
 0x1e2   :  { %v2591_v46 = vpop.f32.mrb[7].mxu1  ;;  %v2557_v60 = vadd.f32 %v2556_v52, %v2555_v34 }
 0x1e3   :  { %v2592_v43 = vadd.f32 %v2591_v46, %v2590_v55 }
 0x1e4   :  { %v880_v54 = vadd.f32 %v2557_v60, %v810_v39 }
 0x1e6   :  { %v3535_v47 = vadd.f32 %v2592_v43, %v880_v54  }
 0x1f0   :  { %v1131_v45 = vpop.f32.mrb[8].mxu0 }
 0x1f1   :  { %v1204_v42 = vpop.f32.mrb[8].mxu1  ;;  %v1132_v44 = vadd.f32 %v1131_v45, %v3544_v59  ;;  %v1133_v50 = vpop.f32.mrb[9].mxu0 }
 0x1f2   :  { %v1205_v62 = vadd.f32 %v1204_v42, %v3546_v49  ;;  %v1206_v36 = vpop.f32.mrb[9].mxu1  ;;  %v1134_v40 = vadd.f32 %v1133_v50, %v3548_v61  ;;  %v1135_v48 = vpop.f32.mrb[10].mxu0 }
 0x1f3   :  { %v1207_v63 = vadd.f32 %v1206_v36, %v3550_v41  ;;  %v1208_v39 = vpop.f32.mrb[10].mxu1  ;;  %1243 = vst [vmem:[#allocation2] sm:$0xff] %v1132_v44  ;;  %v1136_v34 = vadd.f32 %v1135_v48, %v3544_v59  ;;  %v1137_v52 = vpop.f32.mrb[11].mxu0 }
 0x1f4   :  { %1245 = vst [vmem:[#allocation2 + $0x10] sm:$0xff] %v1205_v62  ;;  %v1209_v55 = vadd.f32 %v1208_v39, %v3546_v49  ;;  %v1210_v46 = vpop.f32.mrb[11].mxu1  ;;  %1244 = vst [vmem:[#allocation2 + $0x8] sm:$0xff] %v1134_v40  ;;  %v1138_v32 = vadd.f32 %v1137_v52, %v3548_v61 }
 0x1f5   :  { %1246 = vst [vmem:[#allocation2 + $0x18] sm:$0xff] %v1207_v63  ;;  %v1211_v60 = vadd.f32 %v1210_v46, %v3550_v41  ;;  %1247 = vst [vmem:[#allocation2 + $0x20] sm:$0xff] %v1136_v34 }
 0x1f6   :  { %1249 = vst [vmem:[#allocation2 + $0x30] sm:$0xff] %v1209_v55  ;;  %1248 = vst [vmem:[#allocation2 + $0x28] sm:$0xff] %v1138_v32 }
 0x1f7   :  { %1250 = vst [vmem:[#allocation2 + $0x38] sm:$0xff] %v1211_v60 }
 0x1f8   :  { %v1141_v43 = vpop.f32.mrb[12].mxu0 }
 0x1f9   :  { %v1214_v54 = vpop.f32.mrb[12].mxu1  ;;  %v1142_v51 = vadd.f32 %v1141_v43, %v3544_v59  ;;  %v1143_v58 = vpop.f32.mrb[13].mxu0 }
 0x1fa   :  { %v1215_v53 = vadd.f32 %v1214_v54, %v3546_v49  ;;  %v1216_v57 = vpop.f32.mrb[13].mxu1  ;;  %v1144_v38 = vadd.f32 %v1143_v58, %v3548_v61  ;;  %v1145_v42 = vpop.f32.mrb[14].mxu0 }
 0x1fb   :  { %v1217_v45 = vadd.f32 %v1216_v57, %v3550_v41  ;;  %v1218_v44 = vpop.f32.mrb[14].mxu1  ;;  %1251 = vst [vmem:[#allocation2 + $0x40] sm:$0xff] %v1142_v51  ;;  %v1146_v62 = vadd.f32 %v1145_v42, %v3544_v59  ;;  %v1147_v36 = vpop.f32.mrb[15].mxu0 }
 0x1fc   :  { %1253 = vst [vmem:[#allocation2 + $0x50] sm:$0xff] %v1215_v53  ;;  %v1219_v50 = vadd.f32 %v1218_v44, %v3546_v49  ;;  %v1220_v40 = vpop.f32.mrb[15].mxu1  ;;  %1252 = vst [vmem:[#allocation2 + $0x48] sm:$0xff] %v1144_v38  ;;  %v1148_v63 = vadd.f32 %v1147_v36, %v3548_v61 }
 0x1fd   :  { %1254 = vst [vmem:[#allocation2 + $0x58] sm:$0xff] %v1217_v45  ;;  %v1221_v48 = vadd.f32 %v1220_v40, %v3550_v41  ;;  %1255 = vst [vmem:[#allocation2 + $0x60] sm:$0xff] %v1146_v62 }
 0x1fe   :  { %1257 = vst [vmem:[#allocation2 + $0x70] sm:$0xff] %v1219_v50  ;;  %1256 = vst [vmem:[#allocation2 + $0x68] sm:$0xff] %v1148_v63 }
 0x1ff   :  { %1258 = vst [vmem:[#allocation2 + $0x78] sm:$0xff] %v1221_v48 }
 0x200   :  { %v1151_v39 = vpop.f32.mrb[16].mxu0 }
 0x201   :  { %v1224_v34 = vpop.f32.mrb[16].mxu1  ;;  %v1152_v55 = vadd.f32 %v1151_v39, %v3544_v59  ;;  %v1153_v46 = vpop.f32.mrb[17].mxu0 }
 0x202   :  { %v1225_v52 = vadd.f32 %v1224_v34, %v3546_v49  ;;  %v1226_v32 = vpop.f32.mrb[17].mxu1  ;;  %v1154_v60 = vadd.f32 %v1153_v46, %v3548_v61  ;;  %v1155_v54 = vpop.f32.mrb[18].mxu0 }
 0x203   :  { %v1227_v43 = vadd.f32 %v1226_v32, %v3550_v41  ;;  %v1228_v51 = vpop.f32.mrb[18].mxu1  ;;  %1259 = vst [vmem:[#allocation2 + $0x80] sm:$0xff] %v1152_v55  ;;  %v1156_v53 = vadd.f32 %v1155_v54, %v3544_v59  ;;  %v1157_v57 = vpop.f32.mrb[19].mxu0 }
 0x204   :  { %1261 = vst [vmem:[#allocation2 + $0x90] sm:$0xff] %v1225_v52  ;;  %v1229_v58 = vadd.f32 %v1228_v51, %v3546_v49  ;;  %v1230_v38 = vpop.f32.mrb[19].mxu1  ;;  %1260 = vst [vmem:[#allocation2 + $0x88] sm:$0xff] %v1154_v60  ;;  %v1158_v45 = vadd.f32 %v1157_v57, %v3548_v61  ;;  %v3587_v51 = vmov 0.0  }
 0x205   :  { %1262 = vst [vmem:[#allocation2 + $0x98] sm:$0xff] %v1227_v43  ;;  %v1231_v42 = vadd.f32 %v1230_v38, %v3550_v41  ;;  %1263 = vst [vmem:[#allocation2 + $0xa0] sm:$0xff] %v1156_v53 }
 0x206   :  { %1265 = vst [vmem:[#allocation2 + $0xb0] sm:$0xff] %v1229_v58  ;;  %1264 = vst [vmem:[#allocation2 + $0xa8] sm:$0xff] %v1158_v45 }
 0x207   :  { %1266 = vst [vmem:[#allocation2 + $0xb8] sm:$0xff] %v1231_v42 }
 0x208   :  { %v1161_v44 = vpop.f32.mrb[20].mxu0 }
 0x209   :  { %v1234_v62 = vpop.f32.mrb[20].mxu1  ;;  %v1162_v50 = vadd.f32 %v1161_v44, %v3544_v59  ;;  %v1163_v40 = vpop.f32.mrb[21].mxu0 }
 0x20a   :  { %v1235_v36 = vadd.f32 %v1234_v62, %v3546_v49  ;;  %v1236_v63 = vpop.f32.mrb[21].mxu1  ;;  %v1164_v48 = vadd.f32 %v1163_v40, %v3548_v61  ;;  %v1165_v34 = vpop.f32.mrb[22].mxu0 }
 0x20b   :  { %v1237_v39 = vadd.f32 %v1236_v63, %v3550_v41  ;;  %v1238_v55 = vpop.f32.mrb[22].mxu1  ;;  %1267 = vst [vmem:[#allocation2 + $0xc0] sm:$0xff] %v1162_v50  ;;  %v1166_v52 = vadd.f32 %v1165_v34, %v3544_v59  ;;  %v1167_v32 = vpop.f32.mrb[23].mxu0 }
 0x20c   :  { %1269 = vst [vmem:[#allocation2 + $0xd0] sm:$0xff] %v1235_v36  ;;  %v1239_v46 = vadd.f32 %v1238_v55, %v3546_v49  ;;  %v1240_v60 = vpop.f32.mrb[23].mxu1  ;;  %1268 = vst [vmem:[#allocation2 + $0xc8] sm:$0xff] %v1164_v48  ;;  %v1168_v43 = vadd.f32 %v1167_v32, %v3548_v61 }
 0x20d   :  { %1270 = vst [vmem:[#allocation2 + $0xd8] sm:$0xff] %v1237_v39  ;;  %v1241_v54 = vadd.f32 %v1240_v60, %v3550_v41  ;;  %1271 = vst [vmem:[#allocation2 + $0xe0] sm:$0xff] %v1166_v52 }
 0x20e   :  { %1273 = vst [vmem:[#allocation2 + $0xf0] sm:$0xff] %v1239_v46  ;;  %1272 = vst [vmem:[#allocation2 + $0xe8] sm:$0xff] %v1168_v43 }
 0x20f   :  { %1274 = vst [vmem:[#allocation2 + $0xf8] sm:$0xff] %v1241_v54 }
 0x210 LB: > { %v2885_v59 = vpack.c.bf16 %v3404_v5, %v3396_v1  ;;  %v2887_v49 = vpack.c.bf16 %v3402_v4, %v3394_v0  ;;  %v2889_v61 = vpack.c.bf16 %v3420_v13, %v3412_v9  ;;  %v2917_v41 = vpack.c.bf16 %v3408_v7, %v3400_v3  ;;  %v3816_v34 = vld [vmem:[#allocation25_spill] sm:$0xff]  ;;  %v3818_v46 = vld [vmem:[#allocation23_spill] sm:$0xff]  ;;  %s2312_s27 = sshll.u32 %s3239_s6, 5  ;;  %s2270_s4 = sshll.u32 %s3239_s6, 3  ;;  %s3239_s6 = sphi %s3589_s6, %s1344_s6   ;;  %v3235_v51 = vphi %v3587_v51, %v1523_v51   ;;  %v3231_v47 = vphi %v3535_v47, %v1521_v47  }
 0x211   : > { %v2919_v53 = vpack.c.bf16 %v3406_v6, %v3398_v2  ;;  %v2891_v58 = vpack.c.bf16 %v3418_v12, %v3410_v8  ;;  %v2921_v57 = vpack.c.bf16 %v3424_v15, %v3416_v11  ;;  %v2893_v38 = vpack.c.bf16 %v3436_v21, %v3428_v17  ;;  %v3817_v52 = vld [vmem:[#allocation21_spill] sm:$0xff]  ;;  %v3819_v60 = vld [vmem:[#allocation27_spill] sm:$0xff]  ;;  %s1349_s28 = scalar_lea.vmem [#allocation2], %s2312_s27  ;;  %s1525_s24 = scalar_lea.vmem [#allocation3], %s2270_s4 }
 0x212   : > { %2886 = vmatprep.subr.bf16.mxu0 %v2885_v59  ;;  %2918 = vmatprep.subr.bf16.mxu1 %v2917_v41  ;;  %v2923_v45 = vpack.c.bf16 %v3422_v14, %v3414_v10  ;;  %v2925_v42 = vpack.c.bf16 %v3440_v23, %v3432_v19  ;;  %v3256_v44 = vmov 0.0   ;;  %v2895_v62 = vpack.c.bf16 %v3434_v20, %v3426_v16  ;;  %v3820_v43 = vld [vmem:[#allocation31_spill] sm:$0xff]  ;;  %v3821_v59 = vld [vmem:[#allocation22_spill] sm:$0xff]  ;;  %v3823_v41 = vld [vmem:[#allocation29_spill] sm:$0xff]  ;;  %s1344_s6 = sadd.s32 1, %s3239_s6  }
 0x213   : > { %2888 = vmatpush1.bf16.msra.mxu0 %v2887_v49  ;;  %2920 = vmatpush1.bf16.msra.mxu1 %v2919_v53  ;;  %v2897_v50 = vpack.c.bf16 %v3452_v29, %v3444_v25  ;;  %v2927_v36 = vpack.c.bf16 %v3438_v22, %v3430_v18  ;;  %v2929_v40 = vpack.c.bf16 %v3456_v31, %v3448_v27  ;;  %v3822_v49 = vld [vmem:[#allocation24_spill] sm:$0xff]  ;;  %v3824_v53 = vld [vmem:[#allocation33_spill] sm:$0xff]  ;;  %p1341_p6 = scmp.ge.s32.totalorder %s1344_s6, 8  }
 0x214   : > { %2890 = vmatprep.subr.bf16.mxu0 %v2889_v61  ;;  %2922 = vmatprep.subr.bf16.mxu1 %v2921_v57  ;;  %v2899_v63 = vpack.c.bf16 %v3450_v28, %v3442_v24  ;;  %v2901_v48 = vpack.c.bf16 %v3468_v37, %v3460_v33  ;;  %v2931_v39 = vpack.c.bf16 %v3454_v30, %v3446_v26  ;;  %v3825_v57 = vld [vmem:[#allocation26_spill] sm:$0xff]  ;;  %v3049_v0 = vld [vmem:[#allocation13 + $0x20] sm:$0xff] (%p1341_p6)   ;;  %v3051_v2 = vld [vmem:[#allocation13 + $0x30] sm:$0xff] (%p1341_p6)   ;;  %v3257_v10 = vmov (%p1341_p6), 1966171168  }
 0x215   : > { %1418 = vmatprep.mubr.f32.mxu0 %v3256_v44  ;;  %1489 = vmatprep.mubr.f32.mxu1 %v3256_v44  ;;  %v2933_v55 = vpack.c.bf16 %v3816_v34, %v3464_v35  ;;  %v2903_v32 = vpack.c.bf16 %v3818_v46, %v3817_v52  ;;  %v2905_v54 = vpack.c.bf16 %v3820_v43, %v3819_v60  ;;  %v3828_v44 = vld [vmem:[#allocation39_spill] sm:$0xff]  ;;  %v3833_v34 = vld [vmem:[#allocation34_spill] sm:$0xff]  ;;  %v3837_v43 = vld [vmem:[#allocation36_spill] sm:$0xff]  ;;  %v1678_v11 = vunpack.c.l.s4 (%p1341_p6), %v3257_v10 }
 0x216   : > { %v2935_v61 = vpack.c.bf16 %v3822_v49, %v3821_v59  ;;  %v3835_v46 = vld [vmem:[#allocation43_spill] sm:$0xff]  ;;  %v3839_v49 = vld [vmem:[#allocation45_spill] sm:$0xff]  ;;  %v3050_v1 = vld [vmem:[#allocation13 + $0x28] sm:$0xff] (%p1341_p6)  }
 0x217   : > { %2892 = vmatpush1.bf16.msra.mxu0 %v2891_v58  ;;  %2924 = vmatpush1.bf16.msra.mxu1 %v2923_v45  ;;  %v2937_v58 = vpack.c.bf16 %v3824_v53, %v3823_v41  ;;  %v3841_v53 = vld [vmem:[#allocation42_spill] sm:$0xff]  ;;  %v3052_v3 = vld [vmem:[#allocation13 + $0x38] sm:$0xff] (%p1341_p6)   ;;  %v1679_v12 = vunpack.c.0.s8 (%p1341_p6), %v1678_v11  ;;  %v3679_v13 = vld [vmem:[%s3785_s8] ss:$0 sm:$0xff] (%p1341_p6)  ;;  %s3258_s8 = smov (%p1341_p6), [#allocation15]  }
 0x218   : > { %2894 = vmatprep.subr.bf16.mxu0 %v2893_v38  ;;  %2926 = vmatprep.subr.bf16.mxu1 %v2925_v42  ;;  %v3826_v38 = vld [vmem:[#allocation30_spill] sm:$0xff]  ;;  %v3827_v42 = vld [vmem:[#allocation35_spill] sm:$0xff]  ;;  %s2208_s29 = sshll.u32 (%p1341_p6), %s3258_s8, 4  ;;  %s2209_s29 = int_to_ptr.vmem [resolvable:$true] %s2208_s29 }
 0x219   : > { %v2907_v45 = vpack.c.bf16 %v3826_v38, %v3825_v57  ;;  %v3843_v38 = vld [vmem:[#allocation44_spill] sm:$0xff]  ;;  %v3682_v14 = vsub.s32 (%p1341_p6), %v1679_v12, %v3533_v56  ;;  %s3185_s30 = scalar_lea.vmem (%p1341_p6), %s2209_s29, 1024  ;;  %p3190_p8 = scmp.lt.s32.totalorder (%p1341_p6), %s2209_s29, %s2209_s29 }
 0x21a   :  { %p3186_p7 = scmp.ne.s32.totalorder (%p1341_p6), %s2209_s29, %s3185_s30  ;;  %p3191_p9 = scmp.lt.s32.totalorder (%p1341_p6), %s3185_s30, %s3185_s30 }
 0x21b   : > { %2896 = vmatpush1.bf16.msra.mxu0 %v2895_v62  ;;  %2928 = vmatpush1.bf16.msra.mxu1 %v2927_v36  ;;  %v2909_v62 = vpack.c.bf16 %v3828_v44, %v3827_v42  ;;  %v3830_v36 = vld [vmem:[#allocation32_spill] sm:$0xff]  ;;  %v1350_v44 = vld [vmem:[%s1349_s28] sm:$0xff] }
 0x21c   : > { %2898 = vmatprep.subr.bf16.mxu0 %v2897_v50  ;;  %2930 = vmatprep.subr.bf16.mxu1 %v2929_v40  ;;  %v3829_v50 = vld [vmem:[#allocation28_spill] sm:$0xff]  ;;  %p3192_p10 = por (%p1341_p6), %p3191_p9, %p3190_p8 }
 0x21d   : > { %v2939_v40 = vpack.c.bf16 %v3830_v36, %v3829_v50 }
 0x21e   :  { %p3193_p11 = pnand (%p1341_p6), %p3192_p10, %p3186_p7 }
 0x21f   : > { %2900 = vmatpush1.bf16.msra.mxu0 %v2899_v63  ;;  %2932 = vmatpush1.bf16.msra.mxu1 %v2931_v39  ;;  %v3831_v63 = vld [vmem:[#allocation37_spill] sm:$0xff] }
 0x220   : > { %2902 = vmatprep.subr.bf16.mxu0 %v2901_v48  ;;  %2934 = vmatprep.subr.bf16.mxu1 %v2933_v55  ;;  %v3832_v48 = vld [vmem:[#allocation41_spill] sm:$0xff]  ;;  %v3834_v55 = vld [vmem:[#allocation38_spill] sm:$0xff] }
 0x221   : > { %v2941_v39 = vpack.c.bf16 %v3832_v48, %v3831_v63  ;;  %v2911_v52 = vpack.c.bf16 %v3834_v55, %v3833_v34 }
 0x223   : > { %2904 = vmatpush1.bf16.msra.mxu0 %v2903_v32  ;;  %2936 = vmatpush1.bf16.msra.mxu1 %v2935_v61  ;;  %v3836_v32 = vld [vmem:[#allocation47_spill] sm:$0xff]  ;;  %v3840_v61 = vld [vmem:[#allocation49_spill] sm:$0xff] }
 0x224   : > { %2906 = vmatprep.subr.bf16.mxu0 %v2905_v54  ;;  %2938 = vmatprep.subr.bf16.mxu1 %v2937_v58  ;;  %v2913_v60 = vpack.c.bf16 %v3836_v32, %v3835_v46  ;;  %v3838_v54 = vld [vmem:[#allocation40_spill] sm:$0xff]  ;;  %v2945_v41 = vpack.c.bf16 %v3840_v61, %v3839_v49  ;;  %v3842_v58 = vld [vmem:[#allocation46_spill] sm:$0xff]  ;;  %v1352_v32 = vld [vmem:[%s1349_s28 + $0x10] sm:$0xff] }
 0x225   : > { %v2943_v59 = vpack.c.bf16 %v3838_v54, %v3837_v43  ;;  %v2915_v57 = vpack.c.bf16 %v3842_v58, %v3841_v53 }
 0x227   : > { %2908 = vmatpush1.bf16.msra.mxu0 %v2907_v45  ;;  %2940 = vmatpush1.bf16.msra.mxu1 %v2939_v40  ;;  %v3844_v45 = vld [vmem:[#allocation48_spill] sm:$0xff] }
 0x228   : > { %2910 = vmatprep.subr.bf16.mxu0 %v2909_v62  ;;  %2942 = vmatprep.subr.bf16.mxu1 %v2941_v39  ;;  %v2947_v42 = vpack.c.bf16 %v3844_v45, %v3843_v38  ;;  %v1351_v62 = vld [vmem:[%s1349_s28 + $0x8] sm:$0xff] }
 0x22b   : > { %2912 = vmatpush1.bf16.msra.mxu0 %v2911_v52  ;;  %2944 = vmatpush1.bf16.msra.mxu1 %v2943_v59  ;;  %v1353_v52 = vld [vmem:[%s1349_s28 + $0x18] sm:$0xff] }
 0x22c   : > { %2914 = vmatprep.subr.bf16.mxu0 %v2913_v60  ;;  %2946 = vmatprep.subr.bf16.mxu1 %v2945_v41 }
 0x22f   : > { %2916 = vmatpush1.bf16.msra.mxu0 %v2915_v57  ;;  %2948 = vmatpush1.bf16.msra.mxu1 %v2947_v42 }
 0x232   : > { %1419 = vmatmul.mubr.f32.vlgmr.msra.gmra.mrb[0].mxu0 %v3235_v51  ;;  %1490 = vmatmul.mubr.f32.vlgmr.msra.gmra.mrb[0].mxu1 %v3235_v51 }
 0x305   : > { %v1420_v50 = vpop.f32.mrb[0].mxu0  ;;  %v1491_v48 = vpop.f32.mrb[0].mxu1 }
 0x306   : > { %v1496_v36 = vadd.f32 %v1420_v50, %v1350_v44  ;;  %v1422_v40 = vpop.f32.mrb[1].mxu0  ;;  %v1493_v34 = vpop.f32.mrb[1].mxu1  ;;  %v1498_v43 = vadd.f32 %v1491_v48, %v1352_v32  ;;  %v3046_v50 = vld [vmem:[#allocation13 + $0x8] sm:$0xff] (%p1341_p6)  }
 0x307   : > { %v1497_v63 = vadd.f32 %v1422_v40, %v1351_v62  ;;  %v1499_v46 = vadd.f32 %v1493_v34, %v1353_v52  ;;  %v3045_v62 = vld [vmem:[#allocation13] sm:$0xff] (%p1341_p6)   ;;  %v3048_v40 = vld [vmem:[#allocation13 + $0x18] sm:$0xff] (%p1341_p6)  }
 0x308   : > { %v2267_v39 = vmul.f32 -1.442695, %v1496_v36  ;;  %2605 = vmatprep.subr.bf16.mxu0 (%p1341_p6), %v3045_v62  ;;  %2949 = vmatprep.subr.bf16.mxu1 (%p1341_p6), %v3045_v62  ;;  %v3047_v36 = vld [vmem:[#allocation13 + $0x10] sm:$0xff] (%p1341_p6)  }
 0x309   : > { %v2268_v55 = vmul.f32 -1.442695, %v1497_v63  ;;  %v2269_v60 = vmul.f32 -1.442695, %v1499_v46  ;;  %2606 = vmatpush3.bf16.msra.mxu0 (%p1341_p6), %v3045_v62  ;;  %2957 = vmatpush3.bf16.msra.mxu1 (%p1341_p6), %v3045_v62 }
 0x30a   : > { %3029 = vpow2.f32 %v2267_v39  ;;  %2607 = vmatprep.subr.bf16.mxu0 (%p1341_p6), %v3046_v50  ;;  %2950 = vmatprep.subr.bf16.mxu1 (%p1341_p6), %v3046_v50 }
 0x30b   : > { %3031 = vpow2.f32 %v2268_v55 }
 0x30c   : > { %3033 = vpow2.f32 %v2269_v60 }
 0x30d   : > { %3035 = vtanh.f32 %v1498_v43  ;;  %2608 = vmatpush3.bf16.msra.mxu0 (%p1341_p6), %v3046_v50  ;;  %2958 = vmatpush3.bf16.msra.mxu1 (%p1341_p6), %v3046_v50 }
 0x30e   :  { %2609 = vmatprep.subr.bf16.mxu0 (%p1341_p6), %v3047_v36  ;;  %2951 = vmatprep.subr.bf16.mxu1 (%p1341_p6), %v3047_v36 }
 0x311   :  { %2610 = vmatpush3.bf16.msra.mxu0 (%p1341_p6), %v3047_v36  ;;  %2959 = vmatpush3.bf16.msra.mxu1 (%p1341_p6), %v3047_v36 }
 0x312   :  { %2611 = vmatprep.subr.bf16.mxu0 (%p1341_p6), %v3048_v40  ;;  %2952 = vmatprep.subr.bf16.mxu1 (%p1341_p6), %v3048_v40 }
 0x314   : > { %v3030_v51 = vpop.eup %3029 }
 0x315   : > { %v3032_v54 = vpop.eup %3031  ;;  %v1503_v59 = vadd.f32 1.0, %v3030_v51  ;;  %2612 = vmatpush3.bf16.msra.mxu0 (%p1341_p6), %v3048_v40  ;;  %2960 = vmatpush3.bf16.msra.mxu1 (%p1341_p6), %v3048_v40 }
 0x316   : > { %v1509_v49 = vadd.f32 1.0, %v3032_v54  ;;  %v3034_v61 = vpop.eup %3033  ;;  %2613 = vmatprep.subr.bf16.mxu0 (%p1341_p6), %v3049_v0  ;;  %2953 = vmatprep.subr.bf16.mxu1 (%p1341_p6), %v3049_v0 }
 0x317   : > { %3037 = vrcp.f32 %v1503_v59  ;;  %v3036_v41 = vpop.eup %3035  ;;  %v1516_v58 = vadd.f32 1.0, %v3034_v61 }
 0x318   : > { %3039 = vrcp.f32 %v1509_v49 }
 0x319   : > { %3041 = vrcp.f32 %v1516_v58  ;;  %2614 = vmatpush3.bf16.msra.mxu0 (%p1341_p6), %v3049_v0  ;;  %2961 = vmatpush3.bf16.msra.mxu1 (%p1341_p6), %v3049_v0 }
 0x31a   :  { %2615 = vmatprep.subr.bf16.mxu0 (%p1341_p6), %v3050_v1  ;;  %2954 = vmatprep.subr.bf16.mxu1 (%p1341_p6), %v3050_v1 }
 0x31d   :  { %2616 = vmatpush3.bf16.msra.mxu0 (%p1341_p6), %v3050_v1  ;;  %2962 = vmatpush3.bf16.msra.mxu1 (%p1341_p6), %v3050_v1 }
 0x31e   :  { %2617 = vmatprep.subr.bf16.mxu0 (%p1341_p6), %v3051_v2  ;;  %2955 = vmatprep.subr.bf16.mxu1 (%p1341_p6), %v3051_v2 }
 0x321   : > { %v3038_v53 = vpop.eup %3037  ;;  %2618 = vmatpush3.bf16.msra.mxu0 (%p1341_p6), %v3051_v2  ;;  %2963 = vmatpush3.bf16.msra.mxu1 (%p1341_p6), %v3051_v2 }
 0x322   : > { %v3040_v57 = vpop.eup %3039  ;;  %v1520_v38 = vmul.f32 %v3038_v53, %v3036_v41  ;;  %2619 = vmatprep.subr.bf16.mxu0 (%p1341_p6), %v3052_v3  ;;  %2956 = vmatprep.subr.bf16.mxu1 (%p1341_p6), %v3052_v3 }
 0x323   : > { %v1519_v45 = vmul.f32 %v3231_v47, %v3040_v57  ;;  %v3042_v42 = vpop.eup %3041 }
 0x325   : > { %v1521_v47 = vadd.f32 %v1520_v38, %v1519_v45   ;;  %2620 = vmatpush3.bf16.msra.mxu0 (%p1341_p6), %v3052_v3  ;;  %2964 = vmatpush3.bf16.msra.mxu1 (%p1341_p6), %v3052_v3 }
 0x327   : > { %3043 = vtanh.f32 %v1521_v47 }
 0x32e   :  { %1343 = sbr.rel (!%p1341_p6) target bundleno = 528 (0x210), region = 89 }
 0x331   : > { %v3044_v44 = vpop.eup %3043 }
 0x332   : > { %v1523_v51 = vmul.f32 %v3044_v44, %v3042_v42  }
 0x334   : > { %1526 = vst [vmem:[%s1525_s24] sm:$0xff] %v1523_v51 }
 0x33b   :  { %v1527_v63 = vld [vmem:[#allocation3] sm:$0xff]  ;;  %v1528_v48 = vld [vmem:[#allocation3 + $0x8] sm:$0xff]  ;;  %v1529_v4 = vld [vmem:[#allocation3 + $0x10] sm:$0xff] }
 0x33c   :  { %v1531_v39 = vld [vmem:[#allocation3 + $0x20] sm:$0xff]  ;;  %v1535_v34 = vpack.c.bf16 %v1528_v48, %v1527_v63  ;;  %v1532_v55 = vld [vmem:[#allocation3 + $0x28] sm:$0xff]  ;;  %v1530_v5 = vld [vmem:[#allocation3 + $0x18] sm:$0xff] }
 0x33d   :  { %v1537_v52 = vpack.c.bf16 %v1532_v55, %v1531_v39  ;;  %v1533_v6 = vld [vmem:[#allocation3 + $0x30] sm:$0xff]  ;;  %v1534_v7 = vld [vmem:[#allocation3 + $0x38] sm:$0xff]  ;;  %v1536_v8 = vpack.c.bf16 %v1530_v5, %v1529_v4 }
 0x33e   :  { %2621 = vmatprep.mubr.bf16.mxu0 %v1535_v34  ;;  %v1538_v9 = vpack.c.bf16 %v1534_v7, %v1533_v6 }
 0x33f   :  { %2625 = vmatprep.mubr.bf16.mxu1 %v1537_v52  ;;  %2622 = vmatmul.mubr.bf16.vlgmr.msra.gmra.mrb[0].mxu0 %v1536_v8 }
 0x340   :  { %2626 = vmatmul.mubr.bf16.vlgmr.msra.gmra.mrb[0].mxu1 %v1538_v9 }
 0x412   :  { %v2623_v15 = vpop.f32.mrb[0].mxu0 }
 0x413   :  { %v2627_v16 = vpop.f32.mrb[0].mxu1  ;;  %v1653_v17 = vadd.f32 %v2623_v15, %v3679_v13  ;;  %v1644_v19 = vpop.f32.mrb[1].mxu0 }
 0x414   :  { %v1669_v18 = vadd.f32 %v2627_v16, %v3679_v13  ;;  %v1660_v20 = vpop.f32.mrb[1].mxu1  ;;  %v1645_v21 = vadd.f32 %v3679_v13, %v1644_v19  ;;  %v3690_v23 = vpop.f32.mrb[2].mxu0 }
 0x415   :  { %v3688_v22 = vadd.f32 %v3679_v13, %v1660_v20  ;;  %v3692_v24 = vpop.f32.mrb[2].mxu1  ;;  %v1808_v25 = vcombine.high %v1653_v17, %v1653_v17  ;;  %v1815_v26 = vrot.slane %v1653_v17, %v3682_v14  ;;  %v3696_v29 = vpop.f32.mrb[3].mxu0  ;;  %v1656_v10 = vadd.f32 %v3690_v23, %v3679_v13 }
 0x416   :  { %v2072_v27 = vcombine.high %v1669_v18, %v1669_v18  ;;  %v2079_v28 = vrot.slane %v1669_v18, %v3682_v14  ;;  %v3698_v30 = vpop.f32.mrb[3].mxu1  ;;  %v1676_v31 = vcombine.high %v1645_v21, %v1645_v21  ;;  %v1683_v33 = vrot.slane %v1645_v21, %v3682_v14 }
 0x417   :  { %v1940_v35 = vcombine.high %v3688_v22, %v3688_v22  ;;  %v1947_v37 = vrot.slane %v3688_v22, %v3682_v14  ;;  %v1822_v56 = vrot.slane %v1808_v25, %v3682_v14  ;;  %v1823_v47 = vcombine.high %v1815_v26, %v1815_v26  ;;  %2288 = vst.sshfl [vmem:[#allocation15 + $0x2] sm:$0x1 pattern:$0x73625140] %v1815_v26 }
 0x418   :  { %v1831_v46 = vrot.slane %v1815_v26, %v3682_v14  ;;  %v2086_v32 = vrot.slane %v2072_v27, %v3682_v14  ;;  %2304 = vst.sshfl [vmem:[#allocation15 + $0x6] sm:$0x1 pattern:$0x73625140] %v2079_v28  ;;  %v2087_v60 = vcombine.high %v2079_v28, %v2079_v28  ;;  %v2095_v43 = vrot.slane %v2079_v28, %v3682_v14 }
 0x419   :  { %v1690_v51 = vrot.slane %v1676_v31, %v3682_v14  ;;  %v1691_v54 = vcombine.high %v1683_v33, %v1683_v33  ;;  %2280 = vst.sshfl [vmem:[#allocation15] sm:$0x1 pattern:$0x73625140] %v1683_v33  ;;  %v1824_v59 = vcombine.high %v1822_v56, %v1822_v56  ;;  %v1838_v49 = vrot.slane %v1822_v56, %v3682_v14 }
 0x41a   :  { %2296 = vst.sshfl [vmem:[#allocation15 + $0x4] sm:$0x1 pattern:$0x73625140] %v1947_v37  ;;  %v1845_v61 = vrot.slane %v1823_v47, %v3682_v14  ;;  %v1853_v41 = vcombine.high %v1831_v46, %v1831_v46  ;;  %v2088_v53 = vcombine.high %v2086_v32, %v2086_v32  ;;  %v2102_v58 = vrot.slane %v2086_v32, %v3682_v14 }
 0x41b   :  { %2289 = vst.sshfl [vmem:[#allocation15 + $0xa] sm:$0x1 pattern:$0x73625140] %v1823_v47  ;;  %v2109_v57 = vrot.slane %v2087_v60, %v3682_v14  ;;  %v2117_v38 = vcombine.high %v2095_v43, %v2095_v43  ;;  %v1852_v45 = vrot.slane %v1824_v59, %v3682_v14  ;;  %v1854_v42 = vcombine.high %v1838_v49, %v1838_v49 }
 0x41c   :  { %2290 = vst.sshfl [vmem:[#allocation15 + $0x22] sm:$0x1 pattern:$0x73625140] %v1822_v56  ;;  %v1855_v44 = vcombine.high %v1845_v61, %v1845_v61  ;;  %1867 = vst [vmem:[#allocation15 + $0x12] sm:$0x1] %v1853_v41  ;;  %v1692_v62 = vcombine.high %v1690_v51, %v1690_v51  ;;  %v2116_v50 = vrot.slane %v2088_v53, %v3682_v14 }
 0x41d   :  { %2306 = vst.sshfl [vmem:[#allocation15 + $0x26] sm:$0x1 pattern:$0x73625140] %v2086_v32  ;;  %v2118_v36 = vcombine.high %v2102_v58, %v2102_v58  ;;  %v2119_v40 = vcombine.high %v2109_v57, %v2109_v57  ;;  %2131 = vst [vmem:[#allocation15 + $0x16] sm:$0x1] %v2117_v38  ;;  %v1699_v63 = vrot.slane %v1683_v33, %v3682_v14 }
 0x41e   :  { %2305 = vst.sshfl [vmem:[#allocation15 + $0xe] sm:$0x1 pattern:$0x73625140] %v2087_v60  ;;  %v1856_v48 = vcombine.high %v1852_v45, %v1852_v45  ;;  %1868 = vst [vmem:[#allocation15 + $0x1a] sm:$0x1] %v1855_v44  ;;  %v1706_v39 = vrot.slane %v1690_v51, %v3682_v14  ;;  %v1713_v34 = vrot.slane %v1691_v54, %v3682_v14 }
 0x41f   :  { %2281 = vst.sshfl [vmem:[#allocation15 + $0x8] sm:$0x1 pattern:$0x73625140] %v1691_v54  ;;  %1871 = vst [vmem:[#allocation15 + $0x32] sm:$0x1] %v1854_v42  ;;  %v1720_v55 = vrot.slane %v1692_v62, %v3682_v14  ;;  %v2120_v52 = vcombine.high %v2116_v50, %v2116_v50  ;;  %v1721_v0 = vcombine.high %v1699_v63, %v1699_v63 }
 0x420   :  { %2282 = vst.sshfl [vmem:[#allocation15 + $0x20] sm:$0x1 pattern:$0x73625140] %v1690_v51  ;;  %2132 = vst [vmem:[#allocation15 + $0x1e] sm:$0x1] %v2119_v40  ;;  %v1954_v1 = vrot.slane %v1940_v35, %v3682_v14  ;;  %v1955_v2 = vcombine.high %v1947_v37, %v1947_v37  ;;  %v1722_v3 = vcombine.high %v1706_v39, %v1706_v39 }
 0x421   :  { %2291 = vst.sshfl [vmem:[#allocation15 + $0x2a] sm:$0x1 pattern:$0x73625140] %v1824_v59  ;;  %2135 = vst [vmem:[#allocation15 + $0x36] sm:$0x1] %v2118_v36  ;;  %v1723_v4 = vcombine.high %v1713_v34, %v1713_v34  ;;  %v1724_v5 = vcombine.high %v1720_v55, %v1720_v55  ;;  %v1963_v6 = vrot.slane %v1947_v37, %v3682_v14 }
 0x422   :  { %2307 = vst.sshfl [vmem:[#allocation15 + $0x2e] sm:$0x1 pattern:$0x73625140] %v2088_v53  ;;  %1872 = vst [vmem:[#allocation15 + $0x3a] sm:$0x1] %v1856_v48  ;;  %v1956_v7 = vcombine.high %v1954_v1, %v1954_v1  ;;  %v1970_v8 = vrot.slane %v1954_v1, %v3682_v14  ;;  %v1977_v9 = vrot.slane %v1955_v2, %v3682_v14 }
 0x423   :  { %2283 = vst.sshfl [vmem:[#allocation15 + $0x28] sm:$0x1 pattern:$0x73625140] %v1692_v62  ;;  %2136 = vst [vmem:[#allocation15 + $0x3e] sm:$0x1] %v2120_v52  ;;  %v1985_v11 = vcombine.high %v1963_v6, %v1963_v6  ;;  %v1672_v12 = vadd.f32 %v3692_v24, %v3679_v13  ;;  %v1648_v15 = vadd.f32 %v3679_v13, %v3696_v29 }
 0x424   :  { %1735 = vst [vmem:[#allocation15 + $0x10] sm:$0x1] %v1721_v0  ;;  %2297 = vst.sshfl [vmem:[#allocation15 + $0xc] sm:$0x1 pattern:$0x73625140] %v1955_v2  ;;  %v3732_v16 = vadd.f32 %v3679_v13, %v3698_v30  ;;  %v1984_v17 = vrot.slane %v1956_v7, %v3682_v14  ;;  %v1986_v18 = vcombine.high %v1970_v8, %v1970_v8 }
 0x425   :  { %2298 = vst.sshfl [vmem:[#allocation15 + $0x24] sm:$0x1 pattern:$0x73625140] %v1954_v1  ;;  %1736 = vst [vmem:[#allocation15 + $0x18] sm:$0x1] %v1723_v4  ;;  %v1987_v19 = vcombine.high %v1977_v9, %v1977_v9  ;;  %v1874_v20 = vcombine.high %v1656_v10, %v1656_v10  ;;  %v1881_v21 = vrot.slane %v1656_v10, %v3682_v14 }
 0x426   :  { %1739 = vst [vmem:[#allocation15 + $0x30] sm:$0x1] %v1722_v3  ;;  %1740 = vst [vmem:[#allocation15 + $0x38] sm:$0x1] %v1724_v5  ;;  %v2138_v22 = vcombine.high %v1672_v12, %v1672_v12  ;;  %v2145_v23 = vrot.slane %v1672_v12, %v3682_v14  ;;  %v1742_v24 = vcombine.high %v1648_v15, %v1648_v15 }
 0x427   :  { %2299 = vst.sshfl [vmem:[#allocation15 + $0x2c] sm:$0x1 pattern:$0x73625140] %v1956_v7  ;;  %1999 = vst [vmem:[#allocation15 + $0x14] sm:$0x1] %v1985_v11  ;;  %v1988_v25 = vcombine.high %v1984_v17, %v1984_v17  ;;  %v1888_v26 = vrot.slane %v1874_v20, %v3682_v14  ;;  %v1749_v13 = vrot.slane %v1648_v15, %v3682_v14 }
 0x428   :  { %2000 = vst [vmem:[#allocation15 + $0x1c] sm:$0x1] %v1987_v19  ;;  %2003 = vst [vmem:[#allocation15 + $0x34] sm:$0x1] %v1986_v18  ;;  %v2006_v27 = vcombine.high %v3732_v16, %v3732_v16  ;;  %v1889_v28 = vcombine.high %v1881_v21, %v1881_v21  ;;  %v1897_v29 = vrot.slane %v1881_v21, %v3682_v14 }
 0x429   :  { %2292 = vst.sshfl [vmem:[#allocation15 + $0x3] sm:$0x1 pattern:$0x73625140] %v1881_v21  ;;  %v2152_v30 = vrot.slane %v2138_v22, %v3682_v14  ;;  %v2153_v31 = vcombine.high %v2145_v23, %v2145_v23  ;;  %2004 = vst [vmem:[#allocation15 + $0x3c] sm:$0x1] %v1988_v25  ;;  %v1890_v33 = vcombine.high %v1888_v26, %v1888_v26 }
 0x42a   :  { %2308 = vst.sshfl [vmem:[#allocation15 + $0x7] sm:$0x1 pattern:$0x73625140] %v2145_v23  ;;  %v1904_v35 = vrot.slane %v1888_v26, %v3682_v14  ;;  %v2161_v37 = vrot.slane %v2145_v23, %v3682_v14  ;;  %v1756_v56 = vrot.slane %v1742_v24, %v3682_v14  ;;  %v1911_v47 = vrot.slane %v1889_v28, %v3682_v14 }
 0x42b   :  { %2294 = vst.sshfl [vmem:[#allocation15 + $0x23] sm:$0x1 pattern:$0x73625140] %v1888_v26  ;;  %v1919_v46 = vcombine.high %v1897_v29, %v1897_v29  ;;  %v2154_v32 = vcombine.high %v2152_v30, %v2152_v30  ;;  %v2168_v60 = vrot.slane %v2152_v30, %v3682_v14  ;;  %v1918_v43 = vrot.slane %v1890_v33, %v3682_v14 }
 0x42c   :  { %2284 = vst.sshfl [vmem:[#allocation15 + $0x1] sm:$0x1 pattern:$0x73625140] %v1749_v13  ;;  %v1920_v51 = vcombine.high %v1904_v35, %v1904_v35  ;;  %v2175_v54 = vrot.slane %v2153_v31, %v3682_v14  ;;  %v2183_v59 = vcombine.high %v2161_v37, %v2161_v37  ;;  %v1921_v49 = vcombine.high %v1911_v47, %v1911_v47 }
 0x42d   :  { %2293 = vst.sshfl [vmem:[#allocation15 + $0xb] sm:$0x1 pattern:$0x73625140] %v1889_v28  ;;  %1933 = vst [vmem:[#allocation15 + $0x13] sm:$0x1] %v1919_v46  ;;  %v2182_v61 = vrot.slane %v2154_v32, %v3682_v14  ;;  %v2184_v41 = vcombine.high %v2168_v60, %v2168_v60  ;;  %v1757_v53 = vcombine.high %v1749_v13, %v1749_v13 }
 0x42e   :  { %2309 = vst.sshfl [vmem:[#allocation15 + $0xf] sm:$0x1 pattern:$0x73625140] %v2153_v31  ;;  %v1922_v58 = vcombine.high %v1918_v43, %v1918_v43  ;;  %1937 = vst [vmem:[#allocation15 + $0x33] sm:$0x1] %v1920_v51  ;;  %v2185_v57 = vcombine.high %v2175_v54, %v2175_v54  ;;  %v1758_v38 = vcombine.high %v1756_v56, %v1756_v56 }
 0x42f   :  { %2310 = vst.sshfl [vmem:[#allocation15 + $0x27] sm:$0x1 pattern:$0x73625140] %v2152_v30  ;;  %2197 = vst [vmem:[#allocation15 + $0x17] sm:$0x1] %v2183_v59  ;;  %v1765_v45 = vrot.slane %v1749_v13, %v3682_v14  ;;  %v2186_v42 = vcombine.high %v2182_v61, %v2182_v61  ;;  %v1772_v44 = vrot.slane %v1756_v56, %v3682_v14 }
 0x430   :  { %2295 = vst.sshfl [vmem:[#allocation15 + $0x2b] sm:$0x1 pattern:$0x73625140] %v1890_v33  ;;  %1934 = vst [vmem:[#allocation15 + $0x1b] sm:$0x1] %v1921_v49  ;;  %v1779_v62 = vrot.slane %v1757_v53, %v3682_v14  ;;  %v2013_v50 = vrot.slane %v3732_v16, %v3682_v14  ;;  %v1786_v36 = vrot.slane %v1758_v38, %v3682_v14 }
 0x431   :  { %2286 = vst.sshfl [vmem:[#allocation15 + $0x21] sm:$0x1 pattern:$0x73625140] %v1756_v56  ;;  %2201 = vst [vmem:[#allocation15 + $0x37] sm:$0x1] %v2184_v41  ;;  %v1787_v40 = vcombine.high %v1765_v45, %v1765_v45  ;;  %v2020_v63 = vrot.slane %v2006_v27, %v3682_v14  ;;  %v1788_v48 = vcombine.high %v1772_v44, %v1772_v44 }
 0x432   :  { %2311 = vst.sshfl [vmem:[#allocation15 + $0x2f] sm:$0x1 pattern:$0x73625140] %v2154_v32  ;;  %1938 = vst [vmem:[#allocation15 + $0x3b] sm:$0x1] %v1922_v58  ;;  %v1789_v39 = vcombine.high %v1779_v62, %v1779_v62  ;;  %v2021_v34 = vcombine.high %v2013_v50, %v2013_v50  ;;  %v2029_v55 = vrot.slane %v2013_v50, %v3682_v14 }
 0x433   :  { %2285 = vst.sshfl [vmem:[#allocation15 + $0x9] sm:$0x1 pattern:$0x73625140] %v1757_v53  ;;  %2198 = vst [vmem:[#allocation15 + $0x1f] sm:$0x1] %v2185_v57  ;;  %v1790_v52 = vcombine.high %v1786_v36, %v1786_v36  ;;  %v2022_v0 = vcombine.high %v2020_v63, %v2020_v63  ;;  %v2036_v1 = vrot.slane %v2020_v63, %v3682_v14 }
 0x434   :  { %2287 = vst.sshfl [vmem:[#allocation15 + $0x29] sm:$0x1 pattern:$0x73625140] %v1758_v38  ;;  %2202 = vst [vmem:[#allocation15 + $0x3f] sm:$0x1] %v2186_v42  ;;  %v2043_v2 = vrot.slane %v2021_v34, %v3682_v14  ;;  %v2051_v3 = vcombine.high %v2029_v55, %v2029_v55 }
 0x435   :  { %2300 = vst.sshfl [vmem:[#allocation15 + $0x5] sm:$0x1 pattern:$0x73625140] %v2013_v50  ;;  %1801 = vst [vmem:[#allocation15 + $0x11] sm:$0x1] %v1787_v40  ;;  %v2050_v4 = vrot.slane %v2022_v0, %v3682_v14  ;;  %v2052_v5 = vcombine.high %v2036_v1, %v2036_v1 }
 0x436   :  { %2302 = vst.sshfl [vmem:[#allocation15 + $0x25] sm:$0x1 pattern:$0x73625140] %v2020_v63  ;;  %1802 = vst [vmem:[#allocation15 + $0x19] sm:$0x1] %v1789_v39  ;;  %v2053_v6 = vcombine.high %v2043_v2, %v2043_v2 }
 0x437   :  { %1805 = vst [vmem:[#allocation15 + $0x31] sm:$0x1] %v1788_v48  ;;  %2301 = vst.sshfl [vmem:[#allocation15 + $0xd] sm:$0x1 pattern:$0x73625140] %v2021_v34  ;;  %v2054_v7 = vcombine.high %v2050_v4, %v2050_v4 }
 0x438   :  { %1806 = vst [vmem:[#allocation15 + $0x39] sm:$0x1] %v1790_v52  ;;  %2303 = vst.sshfl [vmem:[#allocation15 + $0x2d] sm:$0x1 pattern:$0x73625140] %v2022_v0 }
 0x439   :  { %2065 = vst [vmem:[#allocation15 + $0x15] sm:$0x1] %v2051_v3  ;;  %2069 = vst [vmem:[#allocation15 + $0x35] sm:$0x1] %v2052_v5 }
 0x43a   :  { %2066 = vst [vmem:[#allocation15 + $0x1d] sm:$0x1] %v2053_v6  ;;  %2070 = vst [vmem:[#allocation15 + $0x3d] sm:$0x1] %v2054_v7 }
 0x43b   :  { %3196 = shalt.err (!%p3193_p11)
}
 0x43c   :  { %s3197_s1 = scalar_lea.hbm %s3786_s9, 1024 }
 0x43d   :  { %p3198_p12 = scmp.ne.s32.totalorder %s3786_s9, %s3197_s1  ;;  %p3201_p13 = scmp.lt.u32.totalorder %s3197_s1, %s3786_s9 }
 0x43f   :  { %p3203_p0 = pnand %p3201_p13, %p3198_p12 }
 0x441   :  { %3206 = shalt.err (!%p3203_p0)
}
 0x442   :  { %2214 = dma.vmem_to_hbm [thread:$0]  %s2209_s29, 1024, %s3786_s9, [#allocation6], %s3242_s19, %s3242_s19, %s3243_s20  }
 0x443   :  { %3227 = dma.done.wait [#allocation6], 1024  }
 0x444   :  { %3228 = vsyncadd [#allocation6], 4294966272 }
 0x445   :  { %2218 = vsyncpa [#allocation5], 1 }
 0x446   :  { %2219 = vsyncpa [#allocation8], 1 }
 0x447   :  { %2220 = vsyncpa [#allocation11], 1 }
 0x448   :  { %2221 = vsyncpa [#allocation14], 1 }
 0x449   :  { %2222 = vsyncpa [#allocation6], 1 }

</bundles_post_ra>
